<compile_context>
chip_gen: v7x
topology: tpu7x:2x2x1
jax: 0.10.0
libtpu: 0.0.40
codegen_flags: <defaults>
</compile_context>

<pallas_src>
import functools

import jax
import jax.numpy as jnp
import numpy as np
from jax.experimental import pallas as pl
from jax.experimental.pallas import tpu as pltpu


# --------------------------------------------------------------------------------------
# Fused kernel: one grid step per batch element, all intermediates VMEM-resident.
# --------------------------------------------------------------------------------------
def up_fused_kernel(x1_ref, x2_ref, bpt_ref, ml_ref, mr_ref,
                    wg_ref, bg_ref, wx_ref, bx_ref, wp_ref, bp_ref,
                    w1_ref, b1_ref, w2_ref, b2_ref,
                    o_ref,
                    pad1_ref, pad2_ref,
                    *, C1, W2t, h_taps):
    Cl = x2_ref.shape[1]            # out_channels (skip branch)
    HWt = x2_ref.shape[2]           # H2t * W2t, flattened target spatial size
    halo = W2t + 1                  # flat halo wide enough for a +-1 row/col shift

    x2f = x2_ref[0]                 # (Cl, HWt) f32

    # Zero the conv halo columns.  Re-done every grid step (only 2*C*halo lanes):
    # a @pl.when(program_id==0) one-shot init is unsafe with a megacore-parallel
    # batch axis because each core holds its own private scratch.
    z1 = jnp.zeros((pad1_ref.shape[0], halo), pad1_ref.dtype)
    pad1_ref[:, :halo] = z1
    pad1_ref[:, halo + HWt:] = z1
    z2 = jnp.zeros((pad2_ref.shape[0], halo), pad2_ref.dtype)
    pad2_ref[:, :halo] = z2
    pad2_ref[:, halo + HWt:] = z2

    # ---- separable bilinear x2 upsample (align_corners=True) + F.pad ---------------
    # W stage: ONE bf16 matmul, rows = H*C1 (h-major layout from the wrapper), K = W.
    t = jnp.dot(x1_ref[0], bpt_ref[...],
                preferred_element_type=jnp.float32)              # (H*C1, W2t) f32

    # H stage: each output row o is a <=2-term weighted sum of input rows (the static
    # sparsity of the align_corners bilinear matrix, baked in at trace time);
    # rows coming from F.pad are plain zeros.
    pieces = []
    for taps in h_taps:
        if not taps:
            pieces.append(jnp.zeros((C1, W2t), jnp.float32))
            continue
        acc = None
        for hidx, wgt in taps:
            term = wgt * t[hidx * C1:(hidx + 1) * C1, :]
            acc = term if acc is None else acc + term
        pieces.append(acc)
    g = jnp.concatenate(pieces, axis=1)                          # (C1, HWt) f32
    g_bf = g.astype(jnp.bfloat16)

    # ---- attention gate: folded 1x1 conv+BN, bf16 MXU / f32 VPU ---------------------
    g1 = jnp.dot(wg_ref[...], g_bf, preferred_element_type=jnp.float32) + bg_ref[...]
    xl = jnp.dot(wx_ref[...], x2f.astype(jnp.bfloat16),
                 preferred_element_type=jnp.float32) + bx_ref[...]
    h = jnp.maximum(g1 + xl, 0.0)                                # (F_int, HWt) f32
    # psi has one output channel and tiny F_int -> VPU mul + sublane sum, no MXU.
    psi = jax.nn.sigmoid(jnp.sum(h * wp_ref[...], axis=0, keepdims=True)
                         + bp_ref[...])                          # (1, HWt) f32
    x2g = x2f * psi                                              # (Cl, HWt) f32

    # ---- cat([x2_gated, x1_up]) written straight into the conv-1 padded scratch ----
    pad1_ref[:Cl, halo:halo + HWt] = x2g.astype(jnp.bfloat16)
    pad1_ref[Cl:Cl + C1, halo:halo + HWt] = g_bf

    ml = ml_ref[...]                # zero columns j == 0        (kx == 0 taps)
    mr = mr_ref[...]                # zero columns j == W2t - 1  (kx == 2 taps)

    def conv3x3_bn_relu(pad_ref, w_ref_, b_ref_):
        # Per-tap accumulation: 9 bf16 matmuls with K = C each, f32 accumulator.
        # (No im2col scratch, no 9*C*HWt store/load traffic.)
        acc = b_ref_[...]                                        # (Cout, 1) f32
        for ky in range(3):
            for kx in range(3):
                k = ky * 3 + kx
                s = (ky - 1) * W2t + (kx - 1)                    # flat shift of tap
                tap = pad_ref[:, halo + s:halo + s + HWt]        # (C, HWt) bf16
                if kx == 0:
                    tap = tap * ml
                elif kx == 2:
                    tap = tap * mr
                acc = acc + jnp.dot(w_ref_[k], tap,
                                    preferred_element_type=jnp.float32)
        return jnp.maximum(acc, 0.0)                             # folded BN + ReLU

    y1 = conv3x3_bn_relu(pad1_ref, w1_ref, b1_ref)               # (C_mid, HWt) f32
    pad2_ref[:, halo:halo + HWt] = y1.astype(jnp.bfloat16)
    y2 = conv3x3_bn_relu(pad2_ref, w2_ref, b2_ref)               # (Cout, HWt) f32
    o_ref[0] = y2.astype(o_ref.dtype)


# --------------------------------------------------------------------------------------
# Trace-time constants (numpy): per-axis interpolation operators, boundary masks
# --------------------------------------------------------------------------------------
def _bilinear_matrix(n_in, n_out):
    """1-D interpolation matrix of Upsample(mode='bilinear', align_corners=True)."""
    m = np.zeros((n_out, n_in), np.float32)
    scale = 0.0 if n_out == 1 else (n_in - 1) / (n_out - 1)
    for i in range(n_out):
        src = i * scale
        lo = int(np.floor(src))
        hi = min(lo + 1, n_in - 1)
        frac = src - lo
        m[i, lo] += 1.0 - frac
        m[i, hi] += frac
    return m


def _separable_interp(H, W, H2t, W2t):
    """Per-axis upsample+pad operators Ap (H2t,H), Bp (W2t,W).  Assumes pad >= 0."""
    A = _bilinear_matrix(H, 2 * H)
    B = _bilinear_matrix(W, 2 * W)
    dY, dX = H2t - 2 * H, W2t - 2 * W                 # F.pad amounts (assumed >= 0)
    Ap = np.zeros((H2t, H), np.float32)
    Ap[dY // 2:dY // 2 + 2 * H] = A
    Bp = np.zeros((W2t, W), np.float32)
    Bp[dX // 2:dX // 2 + 2 * W] = B
    return Ap, Bp


def _column_masks(H2t, W2t):
    col = np.arange(H2t * W2t) % W2t
    ml = (col != 0).astype(np.float32)[None, :]           # valid when j-1 >= 0
    mr = (col != W2t - 1).astype(np.float32)[None, :]     # valid when j+1 <  W2t
    return jnp.asarray(ml, jnp.bfloat16), jnp.asarray(mr, jnp.bfloat16)


# --------------------------------------------------------------------------------------
# Wrapper (pallas_call plumbing)
# --------------------------------------------------------------------------------------
def up_forward(x1, x2, params):
    """x1: (N, in_channels//2, H, W), x2: (N, out_channels, H2t, W2t) -- NCHW."""
    N, C1, H, W = x1.shape
    _, Cl, H2t, W2t = x2.shape
    HWt = H2t * W2t
    halo = W2t + 1
    C_mid = params["w1"].shape[1]
    Cout = params["w2"].shape[1]
    C_cat = Cl + C1

    # (N,C1,H,W) -> (N, H*C1, W): h-major rows so the H-stage of the separable
    # upsample reads contiguous per-row channel blocks.  bf16 feed for the MXU.
    x1hc = jnp.transpose(x1, (0, 2, 1, 3)).reshape(N, H * C1, W).astype(jnp.bfloat16)
    # Free contiguous reshape: spatial rides the 128-lane axis.
    x2f = x2.reshape(N, Cl, HWt)

    Ap, Bp = _separable_interp(H, W, H2t, W2t)
    bpt = jnp.asarray(Bp.T, jnp.bfloat16)                         # (W, W2t)
    # Static <=2-nonzero-per-row sparsity of Ap, baked into the kernel at trace time.
    h_taps = tuple(tuple((int(i), float(Ap[o, i]))
                         for i in np.nonzero(Ap[o])[0])
                   for o in range(H2t))
    mask_l, mask_r = _column_masks(H2t, W2t)

    def const_spec(a):
        z = (0,) * a.ndim
        return pl.BlockSpec(a.shape, lambda n, _z=z: _z)

    kernel = functools.partial(up_fused_kernel, C1=C1, W2t=W2t, h_taps=h_taps)
    out = pl.pallas_call(
        kernel,
        out_shape=jax.ShapeDtypeStruct((N, Cout, HWt), x1.dtype),
        grid=(N,),  # batch axis stays "parallel" so v7x's two TensorCores share work
        in_specs=[
            pl.BlockSpec((1, H * C1, W), lambda n: (n, 0, 0)),
            pl.BlockSpec((1, Cl, HWt), lambda n: (n, 0, 0)),
            const_spec(bpt), const_spec(mask_l), const_spec(mask_r),
            const_spec(params["wg"]), const_spec(params["bg"]),
            const_spec(params["wx"]), const_spec(params["bx"]),
            const_spec(params["wp"]), const_spec(params["bp"]),
            const_spec(params["w1"]), const_spec(params["b1"]),
            const_spec(params["w2"]), const_spec(params["b2"]),
        ],
        out_specs=pl.BlockSpec((1, Cout, HWt), lambda n: (n, 0, 0)),
        scratch_shapes=[
            pltpu.VMEM((C_cat, HWt + 2 * halo), jnp.bfloat16),   # conv1 padded input
            pltpu.VMEM((C_mid, HWt + 2 * halo), jnp.bfloat16),   # conv2 padded input
        ],
        compiler_params=pltpu.CompilerParams(
            dimension_semantics=("parallel",),
            vmem_limit_bytes=32 * 1024 * 1024),
        # TODO(synk): at real U-Net decoder sizes, tile H2t (8-row multiples + 1-row
        # halo), single-buffer the invariant weight operands (pl.Buffered(1)) and
        # re-derive vmem_limit_bytes per generation (64 MiB physical on v7x).
    )(x1hc, x2f, bpt, mask_l, mask_r,
      params["wg"], params["bg"], params["wx"], params["bx"],
      params["wp"], params["bp"],
      params["w1"], params["b1"], params["w2"], params["b2"])
    return out.reshape(N, Cout, H2t, W2t)


# --------------------------------------------------------------------------------------
# Parameters (BatchNorm folded, eval mode; MXU-facing weights stored in bf16)
# --------------------------------------------------------------------------------------
def init_params(key, in_channels, out_channels):
    F_g = in_channels // 2
    F_l = out_channels
    F_int = in_channels // 4
    C_cat = out_channels + in_channels // 2    # channels of cat([x2, x1])
    C_mid = in_channels // 2
    eps = 1e-5
    ks = jax.random.split(key, 10)

    def bn_fold(k, c):
        k1, k2, k3, k4 = jax.random.split(k, 4)
        gamma = 1.0 + 0.1 * jax.random.normal(k1, (c,), jnp.float32)
        beta = 0.1 * jax.random.normal(k2, (c,), jnp.float32)
        mean = 0.1 * jax.random.normal(k3, (c,), jnp.float32)
        var = jax.random.uniform(k4, (c,), jnp.float32, minval=0.5, maxval=1.5)
        scale = gamma / jnp.sqrt(var + eps)
        shift = beta - mean * scale
        return scale, shift

    def conv1x1_bn(kw, kb, kbn, cin, cout):
        w = 0.1 * jax.random.normal(kw, (cout, cin), jnp.float32)  # torch (cout,cin,1,1)
        b = 0.1 * jax.random.normal(kb, (cout,), jnp.float32)
        s, sh = bn_fold(kbn, cout)
        return w * s[:, None], (b * s + sh)[:, None]               # (cout,cin), (cout,1)

    def conv3x3_bn(kw, kbn, cin, cout):
        w = 0.1 * jax.random.normal(kw, (cout, cin, 3, 3), jnp.float32)
        s, sh = bn_fold(kbn, cout)
        # per-tap weight layout: (9, cout, cin) with k = ky*3 + kx; bf16 MXU feed.
        w_eff = jnp.transpose(w * s[:, None, None, None],
                              (2, 3, 0, 1)).reshape(9, cout, cin)
        return w_eff.astype(jnp.bfloat16), sh[:, None]             # (9,cout,cin),(cout,1)

    wg, bg = conv1x1_bn(ks[0], ks[1], ks[2], F_g, F_int)
    wx, bx = conv1x1_bn(ks[3], ks[4], ks[5], F_l, F_int)
    wp, bp = conv1x1_bn(ks[6], ks[7], ks[8], F_int, 1)             # (1,F_int), (1,1)
    ka, kb2, kc, kd = jax.random.split(ks[9], 4)
    w1, b1 = conv3x3_bn(ka, kb2, C_cat, C_mid)
    w2, b2 = conv3x3_bn(kc, kd, C_mid, out_channels)
    return dict(wg=wg.astype(jnp.bfloat16), bg=bg,
                wx=wx.astype(jnp.bfloat16), bx=bx,
                wp=jnp.transpose(wp), bp=bp,                       # wp: (F_int,1) f32
                w1=w1, b1=b1, w2=w2, b2=b2)


# --------------------------------------------------------------------------------------
# Pure-JAX reference (same folded params, f32) for a numerical sanity check
# --------------------------------------------------------------------------------------
def reference(x1, x2, p):
    hp = jax.lax.Precision.HIGHEST
    f32 = jnp.float32
    N, C1, H, W = x1.shape
    A = jnp.asarray(_bilinear_matrix(H, 2 * H))
    B = jnp.asarray(_bilinear_matrix(W, 2 * W))
    x1u = jnp.einsum("oh,nchw->ncow", A, x1, precision=hp)
    x1u = jnp.einsum("ncow,pw->ncop", x1u, B, precision=hp)
    dY = x2.shape[2] - x1u.shape[2]
    dX = x2.shape[3] - x1u.shape[3]
    x1u = jnp.pad(x1u, ((0, 0), (0, 0),
                        (dY // 2, dY - dY // 2), (dX // 2, dX - dX // 2)))
    wg = p["wg"].astype(f32)
    wx = p["wx"].astype(f32)
    g1 = jnp.einsum("fc,nchw->nfhw", wg, x1u, precision=hp) \
        + p["bg"][:, 0][None, :, None, None]
    xl = jnp.einsum("fc,nchw->nfhw", wx, x2, precision=hp) \
        + p["bx"][:, 0][None, :, None, None]
    h = jnp.maximum(g1 + xl, 0.0)
    psi = jax.nn.sigmoid(
        jnp.einsum("f,nfhw->nhw", p["wp"][:, 0], h, precision=hp) + p["bp"][0, 0])
    x2g = x2 * psi[:, None, :, :]
    xcat = jnp.concatenate([x2g, x1u], axis=1)

    def conv(xin, w_taps, b_vec):
        _, cout, cin = w_taps.shape
        w = jnp.transpose(w_taps.astype(f32).reshape(3, 3, cout, cin),
                          (0, 1, 3, 2))                            # HWIO
        y = jax.lax.conv_general_dilated(
            xin, w, (1, 1), ((1, 1), (1, 1)),
            dimension_numbers=("NCHW", "HWIO", "NCHW"), precision=hp)
        return jnp.maximum(y + b_vec[:, 0][None, :, None, None], 0.0)

    y = conv(xcat, p["w1"], p["b1"])
    y = conv(y, p["w2"], p["b2"])
    return y


# --------------------------------------------------------------------------------------
if __name__ == "__main__":
    in_channels, out_channels = 8, 4          # Up(8, 4, bilinear=True)
    N, H, W = 2, 8, 8
    key = jax.random.PRNGKey(0)
    kx1, kx2, kp = jax.random.split(key, 3)
    x1 = jax.random.normal(kx1, (N, in_channels // 2, H, W), jnp.float32)
    x2 = jax.random.normal(kx2, (N, out_channels, 2 * H, 2 * W), jnp.float32)
    params = init_params(kp, in_channels, out_channels)

    out = jax.block_until_ready(jax.jit(up_forward)(x1, x2, params))
    assert out.shape == (N, out_channels, 2 * H, 2 * W), out.shape

    ref = jax.block_until_ready(reference(x1, x2, params))
    # Kernel feeds the MXU in bf16 (f32 accumulation); reference is f32 HIGHEST,
    # same (bf16-rounded) weights -> tolerance covers activation rounding only.
    np.testing.assert_allclose(np.asarray(out), np.asarray(ref), atol=3e-2, rtol=3e-2)

    print("KERNEL_OK")
</pallas_src>

<mosaic_0001>
module attributes {stable_mosaic.version = 11 : i64} {
  func.func @up_fused_kernel(%arg0: i32, %arg1: memref<1x32x8xbf16, #tpu.memory_space<vmem>>, %arg2: memref<1x4x256xf32, #tpu.memory_space<vmem>>, %arg3: memref<8x16xbf16, #tpu.memory_space<vmem>>, %arg4: memref<1x256xbf16, #tpu.memory_space<vmem>>, %arg5: memref<1x256xbf16, #tpu.memory_space<vmem>>, %arg6: memref<2x4xbf16, #tpu.memory_space<vmem>>, %arg7: memref<2x1xf32, #tpu.memory_space<vmem>>, %arg8: memref<2x4xbf16, #tpu.memory_space<vmem>>, %arg9: memref<2x1xf32, #tpu.memory_space<vmem>>, %arg10: memref<2x1xf32, #tpu.memory_space<vmem>>, %arg11: memref<1x1xf32, #tpu.memory_space<vmem>>, %arg12: memref<9x4x8xbf16, #tpu.memory_space<vmem>>, %arg13: memref<4x1xf32, #tpu.memory_space<vmem>>, %arg14: memref<9x4x4xbf16, #tpu.memory_space<vmem>>, %arg15: memref<4x1xf32, #tpu.memory_space<vmem>>, %arg16: memref<1x4x256xf32, #tpu.memory_space<vmem>>, %arg17: memref<8x290xbf16, #tpu.memory_space<vmem>>, %arg18: memref<4x290xbf16, #tpu.memory_space<vmem>>) attributes {dimension_semantics = [#tpu.dimension_semantics<parallel>], iteration_bounds = array<i64: 2>, scalar_prefetch = 0 : i64, scratch_operands = 2 : i64, tpu.core_type = #tpu.core_type<tc>, window_params = [{transform_indices = @transform_0, window_bounds = array<i64: 1, 32, 8>}, {transform_indices = @transform_1, window_bounds = array<i64: 1, 4, 256>}, {pipeline_mode = #tpu.pipeline_mode<synchronous>, transform_indices = @transform_2, window_bounds = array<i64: 8, 16>}, {pipeline_mode = #tpu.pipeline_mode<synchronous>, transform_indices = @transform_3, window_bounds = array<i64: 1, 256>}, {pipeline_mode = #tpu.pipeline_mode<synchronous>, transform_indices = @transform_4, window_bounds = array<i64: 1, 256>}, {pipeline_mode = #tpu.pipeline_mode<synchronous>, transform_indices = @transform_5, window_bounds = array<i64: 2, 4>}, {pipeline_mode = #tpu.pipeline_mode<synchronous>, transform_indices = @transform_6, window_bounds = array<i64: 2, 1>}, {pipeline_mode = #tpu.pipeline_mode<synchronous>, transform_indices = @transform_7, window_bounds = array<i64: 2, 4>}, {pipeline_mode = #tpu.pipeline_mode<synchronous>, transform_indices = @transform_8, window_bounds = array<i64: 2, 1>}, {pipeline_mode = #tpu.pipeline_mode<synchronous>, transform_indices = @transform_9, window_bounds = array<i64: 2, 1>}, {pipeline_mode = #tpu.pipeline_mode<synchronous>, transform_indices = @transform_10, window_bounds = array<i64: 1, 1>}, {pipeline_mode = #tpu.pipeline_mode<synchronous>, transform_indices = @transform_11, window_bounds = array<i64: 9, 4, 8>}, {pipeline_mode = #tpu.pipeline_mode<synchronous>, transform_indices = @transform_12, window_bounds = array<i64: 4, 1>}, {pipeline_mode = #tpu.pipeline_mode<synchronous>, transform_indices = @transform_13, window_bounds = array<i64: 9, 4, 4>}, {pipeline_mode = #tpu.pipeline_mode<synchronous>, transform_indices = @transform_14, window_bounds = array<i64: 4, 1>}, {transform_indices = @transform_15, window_bounds = array<i64: 1, 4, 256>}]} {
    %c0 = arith.constant 0 : index
    %c0_0 = arith.constant 0 : index
    %c0_1 = arith.constant 0 : index
    %0 = vector.load %arg2[%c0, %c0_0, %c0_1] : memref<1x4x256xf32, #tpu.memory_space<vmem>>, vector<1x4x256xf32>
    %1 = vector.shape_cast %0 : vector<1x4x256xf32> to vector<4x256xf32>
    %cst = arith.constant 0.000000e+00 : bf16
    %2 = vector.broadcast %cst : bf16 to vector<8x17xbf16>
    %c0_2 = arith.constant 0 : index
    %c0_3 = arith.constant 0 : index
    %3 = vector.load %arg17[%c0_2, %c0_3] : memref<8x290xbf16, #tpu.memory_space<vmem>>, vector<8x17xbf16>
    tpu.vector_store %arg17[%c0_2, %c0_3], %2 {strides = array<i32>} : memref<8x290xbf16, #tpu.memory_space<vmem>>, vector<8x17xbf16>,
    %c0_4 = arith.constant 0 : index
    %c273 = arith.constant 273 : index
    %4 = vector.load %arg17[%c0_4, %c273] : memref<8x290xbf16, #tpu.memory_space<vmem>>, vector<8x17xbf16>
    tpu.vector_store %arg17[%c0_4, %c273], %2 {strides = array<i32>} : memref<8x290xbf16, #tpu.memory_space<vmem>>, vector<8x17xbf16>,
    %cst_5 = arith.constant 0.000000e+00 : bf16
    %5 = vector.broadcast %cst_5 : bf16 to vector<4x17xbf16>
    %c0_6 = arith.constant 0 : index
    %c0_7 = arith.constant 0 : index
    %6 = vector.load %arg18[%c0_6, %c0_7] : memref<4x290xbf16, #tpu.memory_space<vmem>>, vector<4x17xbf16>
    tpu.vector_store %arg18[%c0_6, %c0_7], %5 {strides = array<i32>} : memref<4x290xbf16, #tpu.memory_space<vmem>>, vector<4x17xbf16>,
    %c0_8 = arith.constant 0 : index
    %c273_9 = arith.constant 273 : index
    %7 = vector.load %arg18[%c0_8, %c273_9] : memref<4x290xbf16, #tpu.memory_space<vmem>>, vector<4x17xbf16>
    tpu.vector_store %arg18[%c0_8, %c273_9], %5 {strides = array<i32>} : memref<4x290xbf16, #tpu.memory_space<vmem>>, vector<4x17xbf16>,
    %c0_10 = arith.constant 0 : index
    %c0_11 = arith.constant 0 : index
    %c0_12 = arith.constant 0 : index
    %8 = vector.load %arg1[%c0_10, %c0_11, %c0_12] : memref<1x32x8xbf16, #tpu.memory_space<vmem>>, vector<1x32x8xbf16>
    %9 = vector.shape_cast %8 : vector<1x32x8xbf16> to vector<32x8xbf16>
    %c0_13 = arith.constant 0 : index
    %c0_14 = arith.constant 0 : index
    %10 = vector.load %arg3[%c0_13, %c0_14] : memref<8x16xbf16, #tpu.memory_space<vmem>>, vector<8x16xbf16>
    %cst_15 = arith.constant dense<0.000000e+00> : vector<32x16xf32>
    %11 = tpu.matmul %9, %10, %cst_15 {dimension_numbers = #tpu.dot_dimension_numbers<[1], [0], [0], [1], [0, 0, 1, 1], [], []>} : vector<32x8xbf16>, vector<8x16xbf16>, vector<32x16xf32> -> vector<32x16xf32>
    %12 = vector.extract_strided_slice %11 {offsets = [0, 0], sizes = [4, 16], strides = [1, 1]} : vector<32x16xf32> to vector<4x16xf32>
    %cst_16 = arith.constant 1.000000e+00 : f32
    %13 = vector.broadcast %cst_16 : f32 to vector<4x16xf32>
    %14 = arith.mulf %13, %12 : vector<4x16xf32>
    %15 = vector.extract_strided_slice %11 {offsets = [0, 0], sizes = [4, 16], strides = [1, 1]} : vector<32x16xf32> to vector<4x16xf32>
    %cst_17 = arith.constant 0.533333361 : f32
    %16 = vector.broadcast %cst_17 : f32 to vector<4x16xf32>
    %17 = arith.mulf %16, %15 : vector<4x16xf32>
    %18 = vector.extract_strided_slice %11 {offsets = [4, 0], sizes = [4, 16], strides = [1, 1]} : vector<32x16xf32> to vector<4x16xf32>
    %cst_18 = arith.constant 0.466666669 : f32
    %19 = vector.broadcast %cst_18 : f32 to vector<4x16xf32>
    %20 = arith.mulf %19, %18 : vector<4x16xf32>
    %21 = arith.addf %17, %20 : vector<4x16xf32>
    %22 = vector.extract_strided_slice %11 {offsets = [0, 0], sizes = [4, 16], strides = [1, 1]} : vector<32x16xf32> to vector<4x16xf32>
    %cst_19 = arith.constant 0.0666666701 : f32
    %23 = vector.broadcast %cst_19 : f32 to vector<4x16xf32>
    %24 = arith.mulf %23, %22 : vector<4x16xf32>
    %25 = vector.extract_strided_slice %11 {offsets = [4, 0], sizes = [4, 16], strides = [1, 1]} : vector<32x16xf32> to vector<4x16xf32>
    %cst_20 = arith.constant 0.933333337 : f32
    %26 = vector.broadcast %cst_20 : f32 to vector<4x16xf32>
    %27 = arith.mulf %26, %25 : vector<4x16xf32>
    %28 = arith.addf %24, %27 : vector<4x16xf32>
    %29 = vector.extract_strided_slice %11 {offsets = [4, 0], sizes = [4, 16], strides = [1, 1]} : vector<32x16xf32> to vector<4x16xf32>
    %cst_21 = arith.constant 6.000000e-01 : f32
    %30 = vector.broadcast %cst_21 : f32 to vector<4x16xf32>
    %31 = arith.mulf %30, %29 : vector<4x16xf32>
    %32 = vector.extract_strided_slice %11 {offsets = [8, 0], sizes = [4, 16], strides = [1, 1]} : vector<32x16xf32> to vector<4x16xf32>
    %cst_22 = arith.constant 4.000000e-01 : f32
    %33 = vector.broadcast %cst_22 : f32 to vector<4x16xf32>
    %34 = arith.mulf %33, %32 : vector<4x16xf32>
    %35 = arith.addf %31, %34 : vector<4x16xf32>
    %36 = vector.extract_strided_slice %11 {offsets = [4, 0], sizes = [4, 16], strides = [1, 1]} : vector<32x16xf32> to vector<4x16xf32>
    %cst_23 = arith.constant 0.13333334 : f32
    %37 = vector.broadcast %cst_23 : f32 to vector<4x16xf32>
    %38 = arith.mulf %37, %36 : vector<4x16xf32>
    %39 = vector.extract_strided_slice %11 {offsets = [8, 0], sizes = [4, 16], strides = [1, 1]} : vector<32x16xf32> to vector<4x16xf32>
    %cst_24 = arith.constant 0.866666674 : f32
    %40 = vector.broadcast %cst_24 : f32 to vector<4x16xf32>
    %41 = arith.mulf %40, %39 : vector<4x16xf32>
    %42 = arith.addf %38, %41 : vector<4x16xf32>
    %43 = vector.extract_strided_slice %11 {offsets = [8, 0], sizes = [4, 16], strides = [1, 1]} : vector<32x16xf32> to vector<4x16xf32>
    %cst_25 = arith.constant 0.666666686 : f32
    %44 = vector.broadcast %cst_25 : f32 to vector<4x16xf32>
    %45 = arith.mulf %44, %43 : vector<4x16xf32>
    %46 = vector.extract_strided_slice %11 {offsets = [12, 0], sizes = [4, 16], strides = [1, 1]} : vector<32x16xf32> to vector<4x16xf32>
    %cst_26 = arith.constant 0.333333343 : f32
    %47 = vector.broadcast %cst_26 : f32 to vector<4x16xf32>
    %48 = arith.mulf %47, %46 : vector<4x16xf32>
    %49 = arith.addf %45, %48 : vector<4x16xf32>
    %50 = vector.extract_strided_slice %11 {offsets = [8, 0], sizes = [4, 16], strides = [1, 1]} : vector<32x16xf32> to vector<4x16xf32>
    %cst_27 = arith.constant 2.000000e-01 : f32
    %51 = vector.broadcast %cst_27 : f32 to vector<4x16xf32>
    %52 = arith.mulf %51, %50 : vector<4x16xf32>
    %53 = vector.extract_strided_slice %11 {offsets = [12, 0], sizes = [4, 16], strides = [1, 1]} : vector<32x16xf32> to vector<4x16xf32>
    %cst_28 = arith.constant 8.000000e-01 : f32
    %54 = vector.broadcast %cst_28 : f32 to vector<4x16xf32>
    %55 = arith.mulf %54, %53 : vector<4x16xf32>
    %56 = arith.addf %52, %55 : vector<4x16xf32>
    %57 = vector.extract_strided_slice %11 {offsets = [12, 0], sizes = [4, 16], strides = [1, 1]} : vector<32x16xf32> to vector<4x16xf32>
    %cst_29 = arith.constant 0.733333349 : f32
    %58 = vector.broadcast %cst_29 : f32 to vector<4x16xf32>
    %59 = arith.mulf %58, %57 : vector<4x16xf32>
    %60 = vector.extract_strided_slice %11 {offsets = [16, 0], sizes = [4, 16], strides = [1, 1]} : vector<32x16xf32> to vector<4x16xf32>
    %cst_30 = arith.constant 0.266666681 : f32
    %61 = vector.broadcast %cst_30 : f32 to vector<4x16xf32>
    %62 = arith.mulf %61, %60 : vector<4x16xf32>
    %63 = arith.addf %59, %62 : vector<4x16xf32>
    %64 = vector.extract_strided_slice %11 {offsets = [12, 0], sizes = [4, 16], strides = [1, 1]} : vector<32x16xf32> to vector<4x16xf32>
    %cst_31 = arith.constant 0.266666681 : f32
    %65 = vector.broadcast %cst_31 : f32 to vector<4x16xf32>
    %66 = arith.mulf %65, %64 : vector<4x16xf32>
    %67 = vector.extract_strided_slice %11 {offsets = [16, 0], sizes = [4, 16], strides = [1, 1]} : vector<32x16xf32> to vector<4x16xf32>
    %cst_32 = arith.constant 0.733333349 : f32
    %68 = vector.broadcast %cst_32 : f32 to vector<4x16xf32>
    %69 = arith.mulf %68, %67 : vector<4x16xf32>
    %70 = arith.addf %66, %69 : vector<4x16xf32>
    %71 = vector.extract_strided_slice %11 {offsets = [16, 0], sizes = [4, 16], strides = [1, 1]} : vector<32x16xf32> to vector<4x16xf32>
    %cst_33 = arith.constant 8.000000e-01 : f32
    %72 = vector.broadcast %cst_33 : f32 to vector<4x16xf32>
    %73 = arith.mulf %72, %71 : vector<4x16xf32>
    %74 = vector.extract_strided_slice %11 {offsets = [20, 0], sizes = [4, 16], strides = [1, 1]} : vector<32x16xf32> to vector<4x16xf32>
    %cst_34 = arith.constant 2.000000e-01 : f32
    %75 = vector.broadcast %cst_34 : f32 to vector<4x16xf32>
    %76 = arith.mulf %75, %74 : vector<4x16xf32>
    %77 = arith.addf %73, %76 : vector<4x16xf32>
    %78 = vector.extract_strided_slice %11 {offsets = [16, 0], sizes = [4, 16], strides = [1, 1]} : vector<32x16xf32> to vector<4x16xf32>
    %cst_35 = arith.constant 0.333333343 : f32
    %79 = vector.broadcast %cst_35 : f32 to vector<4x16xf32>
    %80 = arith.mulf %79, %78 : vector<4x16xf32>
    %81 = vector.extract_strided_slice %11 {offsets = [20, 0], sizes = [4, 16], strides = [1, 1]} : vector<32x16xf32> to vector<4x16xf32>
    %cst_36 = arith.constant 0.666666686 : f32
    %82 = vector.broadcast %cst_36 : f32 to vector<4x16xf32>
    %83 = arith.mulf %82, %81 : vector<4x16xf32>
    %84 = arith.addf %80, %83 : vector<4x16xf32>
    %85 = vector.extract_strided_slice %11 {offsets = [20, 0], sizes = [4, 16], strides = [1, 1]} : vector<32x16xf32> to vector<4x16xf32>
    %cst_37 = arith.constant 0.866666674 : f32
    %86 = vector.broadcast %cst_37 : f32 to vector<4x16xf32>
    %87 = arith.mulf %86, %85 : vector<4x16xf32>
    %88 = vector.extract_strided_slice %11 {offsets = [24, 0], sizes = [4, 16], strides = [1, 1]} : vector<32x16xf32> to vector<4x16xf32>
    %cst_38 = arith.constant 0.13333334 : f32
    %89 = vector.broadcast %cst_38 : f32 to vector<4x16xf32>
    %90 = arith.mulf %89, %88 : vector<4x16xf32>
    %91 = arith.addf %87, %90 : vector<4x16xf32>
    %92 = vector.extract_strided_slice %11 {offsets = [20, 0], sizes = [4, 16], strides = [1, 1]} : vector<32x16xf32> to vector<4x16xf32>
    %cst_39 = arith.constant 4.000000e-01 : f32
    %93 = vector.broadcast %cst_39 : f32 to vector<4x16xf32>
    %94 = arith.mulf %93, %92 : vector<4x16xf32>
    %95 = vector.extract_strided_slice %11 {offsets = [24, 0], sizes = [4, 16], strides = [1, 1]} : vector<32x16xf32> to vector<4x16xf32>
    %cst_40 = arith.constant 6.000000e-01 : f32
    %96 = vector.broadcast %cst_40 : f32 to vector<4x16xf32>
    %97 = arith.mulf %96, %95 : vector<4x16xf32>
    %98 = arith.addf %94, %97 : vector<4x16xf32>
    %99 = vector.extract_strided_slice %11 {offsets = [24, 0], sizes = [4, 16], strides = [1, 1]} : vector<32x16xf32> to vector<4x16xf32>
    %cst_41 = arith.constant 0.933333337 : f32
    %100 = vector.broadcast %cst_41 : f32 to vector<4x16xf32>
    %101 = arith.mulf %100, %99 : vector<4x16xf32>
    %102 = vector.extract_strided_slice %11 {offsets = [28, 0], sizes = [4, 16], strides = [1, 1]} : vector<32x16xf32> to vector<4x16xf32>
    %cst_42 = arith.constant 0.0666666701 : f32
    %103 = vector.broadcast %cst_42 : f32 to vector<4x16xf32>
    %104 = arith.mulf %103, %102 : vector<4x16xf32>
    %105 = arith.addf %101, %104 : vector<4x16xf32>
    %106 = vector.extract_strided_slice %11 {offsets = [24, 0], sizes = [4, 16], strides = [1, 1]} : vector<32x16xf32> to vector<4x16xf32>
    %cst_43 = arith.constant 0.466666669 : f32
    %107 = vector.broadcast %cst_43 : f32 to vector<4x16xf32>
    %108 = arith.mulf %107, %106 : vector<4x16xf32>
    %109 = vector.extract_strided_slice %11 {offsets = [28, 0], sizes = [4, 16], strides = [1, 1]} : vector<32x16xf32> to vector<4x16xf32>
    %cst_44 = arith.constant 0.533333361 : f32
    %110 = vector.broadcast %cst_44 : f32 to vector<4x16xf32>
    %111 = arith.mulf %110, %109 : vector<4x16xf32>
    %112 = arith.addf %108, %111 : vector<4x16xf32>
    %113 = vector.extract_strided_slice %11 {offsets = [28, 0], sizes = [4, 16], strides = [1, 1]} : vector<32x16xf32> to vector<4x16xf32>
    %cst_45 = arith.constant 1.000000e+00 : f32
    %114 = vector.broadcast %cst_45 : f32 to vector<4x16xf32>
    %115 = arith.mulf %114, %113 : vector<4x16xf32>
    %116 = tpu.concatenate %14, %21, %28, %35, %42, %49, %56, %63, %70, %77, %84, %91, %98, %105, %112, %115 in 1 : vector<4x16xf32>, vector<4x16xf32>, vector<4x16xf32>, vector<4x16xf32>, vector<4x16xf32>, vector<4x16xf32>, vector<4x16xf32>, vector<4x16xf32>, vector<4x16xf32>, vector<4x16xf32>, vector<4x16xf32>, vector<4x16xf32>, vector<4x16xf32>, vector<4x16xf32>, vector<4x16xf32>, vector<4x16xf32> -> vector<4x256xf32>
    %117 = arith.truncf %116 : vector<4x256xf32> to vector<4x256xbf16>
    %c0_46 = arith.constant 0 : index
    %c0_47 = arith.constant 0 : index
    %118 = vector.load %arg6[%c0_46, %c0_47] : memref<2x4xbf16, #tpu.memory_space<vmem>>, vector<2x4xbf16>
    %cst_48 = arith.constant dense<0.000000e+00> : vector<2x256xf32>
    %119 = tpu.matmul %118, %117, %cst_48 {dimension_numbers = #tpu.dot_dimension_numbers<[1], [0], [0], [1], [0, 0, 1, 1], [], []>} : vector<2x4xbf16>, vector<4x256xbf16>, vector<2x256xf32> -> vector<2x256xf32>
    %c0_49 = arith.constant 0 : index
    %c0_50 = arith.constant 0 : index
    %120 = vector.load %arg7[%c0_49, %c0_50] : memref<2x1xf32, #tpu.memory_space<vmem>>, vector<2x1xf32>
    %121 = vector.broadcast %120 : vector<2x1xf32> to vector<2x256xf32>
    %122 = arith.addf %119, %121 : vector<2x256xf32>
    %c0_51 = arith.constant 0 : index
    %c0_52 = arith.constant 0 : index
    %123 = vector.load %arg8[%c0_51, %c0_52] : memref<2x4xbf16, #tpu.memory_space<vmem>>, vector<2x4xbf16>
    %124 = arith.truncf %1 : vector<4x256xf32> to vector<4x256xbf16>
    %cst_53 = arith.constant dense<0.000000e+00> : vector<2x256xf32>
    %125 = tpu.matmul %123, %124, %cst_53 {dimension_numbers = #tpu.dot_dimension_numbers<[1], [0], [0], [1], [0, 0, 1, 1], [], []>} : vector<2x4xbf16>, vector<4x256xbf16>, vector<2x256xf32> -> vector<2x256xf32>
    %c0_54 = arith.constant 0 : index
    %c0_55 = arith.constant 0 : index
    %126 = vector.load %arg9[%c0_54, %c0_55] : memref<2x1xf32, #tpu.memory_space<vmem>>, vector<2x1xf32>
    %127 = vector.broadcast %126 : vector<2x1xf32> to vector<2x256xf32>
    %128 = arith.addf %125, %127 : vector<2x256xf32>
    %129 = arith.addf %122, %128 : vector<2x256xf32>
    %cst_56 = arith.constant 0.000000e+00 : f32
    %130 = vector.broadcast %cst_56 : f32 to vector<2x256xf32>
    %131 = arith.maximumf %129, %130 : vector<2x256xf32>
    %c0_57 = arith.constant 0 : index
    %c0_58 = arith.constant 0 : index
    %132 = vector.load %arg10[%c0_57, %c0_58] : memref<2x1xf32, #tpu.memory_space<vmem>>, vector<2x1xf32>
    %133 = vector.broadcast %132 : vector<2x1xf32> to vector<2x256xf32>
    %134 = arith.mulf %131, %133 : vector<2x256xf32>
    %cst_59 = arith.constant dense<0.000000e+00> : vector<256xf32>
    %135 = vector.multi_reduction <add>, %134, %cst_59 [0] : vector<2x256xf32> to vector<256xf32>
    %136 = vector.shape_cast %135 : vector<256xf32> to vector<1x256xf32>
    %c0_60 = arith.constant 0 : index
    %c0_61 = arith.constant 0 : index
    %137 = vector.load %arg11[%c0_60, %c0_61] : memref<1x1xf32, #tpu.memory_space<vmem>>, vector<1x1xf32>
    %138 = vector.broadcast %137 : vector<1x1xf32> to vector<1x256xf32>
    %139 = arith.addf %136, %138 : vector<1x256xf32>
    %140 = arith.negf %139 : vector<1x256xf32>
    %141 = math.exp %140 : vector<1x256xf32>
    %cst_62 = arith.constant 1.000000e+00 : f32
    %142 = vector.broadcast %cst_62 : f32 to vector<1x256xf32>
    %143 = arith.addf %142, %141 : vector<1x256xf32>
    %144 = arith.divf %142, %143 : vector<1x256xf32>
    %145 = vector.broadcast %144 : vector<1x256xf32> to vector<4x256xf32>
    %146 = arith.mulf %1, %145 : vector<4x256xf32>
    %147 = arith.truncf %146 : vector<4x256xf32> to vector<4x256xbf16>
    %c0_63 = arith.constant 0 : index
    %c17 = arith.constant 17 : index
    %148 = vector.load %arg17[%c0_63, %c17] : memref<8x290xbf16, #tpu.memory_space<vmem>>, vector<4x256xbf16>
    tpu.vector_store %arg17[%c0_63, %c17], %147 {strides = array<i32>} : memref<8x290xbf16, #tpu.memory_space<vmem>>, vector<4x256xbf16>,
    %c4 = arith.constant 4 : index
    %c17_64 = arith.constant 17 : index
    %149 = vector.load %arg17[%c4, %c17_64] : memref<8x290xbf16, #tpu.memory_space<vmem>>, vector<4x256xbf16>
    tpu.vector_store %arg17[%c4, %c17_64], %117 {strides = array<i32>} : memref<8x290xbf16, #tpu.memory_space<vmem>>, vector<4x256xbf16>,
    %c0_65 = arith.constant 0 : index
    %c0_66 = arith.constant 0 : index
    %150 = vector.load %arg4[%c0_65, %c0_66] : memref<1x256xbf16, #tpu.memory_space<vmem>>, vector<1x256xbf16>
    %c0_67 = arith.constant 0 : index
    %c0_68 = arith.constant 0 : index
    %151 = vector.load %arg5[%c0_67, %c0_68] : memref<1x256xbf16, #tpu.memory_space<vmem>>, vector<1x256xbf16>
    %c0_69 = arith.constant 0 : index
    %c0_70 = arith.constant 0 : index
    %152 = vector.load %arg13[%c0_69, %c0_70] : memref<4x1xf32, #tpu.memory_space<vmem>>, vector<4x1xf32>
    %c0_71 = arith.constant 0 : index
    %c0_72 = arith.constant 0 : index
    %153 = vector.load %arg17[%c0_71, %c0_72] : memref<8x290xbf16, #tpu.memory_space<vmem>>, vector<8x256xbf16>
    %154 = vector.broadcast %150 : vector<1x256xbf16> to vector<8x256xbf16>
    %155 = arith.mulf %153, %154 : vector<8x256xbf16>
    %c0_73 = arith.constant 0 : index
    %c0_74 = arith.constant 0 : index
    %c0_75 = arith.constant 0 : index
    %156 = vector.load %arg12[%c0_73, %c0_74, %c0_75] : memref<9x4x8xbf16, #tpu.memory_space<vmem>>, vector<1x4x8xbf16>
    %157 = vector.shape_cast %156 : vector<1x4x8xbf16> to vector<4x8xbf16>
    %cst_76 = arith.constant dense<0.000000e+00> : vector<4x256xf32>
    %158 = tpu.matmul %157, %155, %cst_76 {dimension_numbers = #tpu.dot_dimension_numbers<[1], [0], [0], [1], [0, 0, 1, 1], [], []>} : vector<4x8xbf16>, vector<8x256xbf16>, vector<4x256xf32> -> vector<4x256xf32>
    %159 = vector.broadcast %152 : vector<4x1xf32> to vector<4x256xf32>
    %160 = arith.addf %159, %158 : vector<4x256xf32>
    %c0_77 = arith.constant 0 : index
    %c1 = arith.constant 1 : index
    %161 = vector.load %arg17[%c0_77, %c1] : memref<8x290xbf16, #tpu.memory_space<vmem>>, vector<8x256xbf16>
    %c1_78 = arith.constant 1 : index
    %c0_79 = arith.constant 0 : index
    %c0_80 = arith.constant 0 : index
    %162 = vector.load %arg12[%c1_78, %c0_79, %c0_80] : memref<9x4x8xbf16, #tpu.memory_space<vmem>>, vector<1x4x8xbf16>
    %163 = vector.shape_cast %162 : vector<1x4x8xbf16> to vector<4x8xbf16>
    %cst_81 = arith.constant dense<0.000000e+00> : vector<4x256xf32>
    %164 = tpu.matmul %163, %161, %cst_81 {dimension_numbers = #tpu.dot_dimension_numbers<[1], [0], [0], [1], [0, 0, 1, 1], [], []>} : vector<4x8xbf16>, vector<8x256xbf16>, vector<4x256xf32> -> vector<4x256xf32>
    %165 = arith.addf %160, %164 : vector<4x256xf32>
    %c0_82 = arith.constant 0 : index
    %c2 = arith.constant 2 : index
    %166 = vector.load %arg17[%c0_82, %c2] : memref<8x290xbf16, #tpu.memory_space<vmem>>, vector<8x256xbf16>
    %167 = vector.broadcast %151 : vector<1x256xbf16> to vector<8x256xbf16>
    %168 = arith.mulf %166, %167 : vector<8x256xbf16>
    %c2_83 = arith.constant 2 : index
    %c0_84 = arith.constant 0 : index
    %c0_85 = arith.constant 0 : index
    %169 = vector.load %arg12[%c2_83, %c0_84, %c0_85] : memref<9x4x8xbf16, #tpu.memory_space<vmem>>, vector<1x4x8xbf16>
    %170 = vector.shape_cast %169 : vector<1x4x8xbf16> to vector<4x8xbf16>
    %cst_86 = arith.constant dense<0.000000e+00> : vector<4x256xf32>
    %171 = tpu.matmul %170, %168, %cst_86 {dimension_numbers = #tpu.dot_dimension_numbers<[1], [0], [0], [1], [0, 0, 1, 1], [], []>} : vector<4x8xbf16>, vector<8x256xbf16>, vector<4x256xf32> -> vector<4x256xf32>
    %172 = arith.addf %165, %171 : vector<4x256xf32>
    %c0_87 = arith.constant 0 : index
    %c16 = arith.constant 16 : index
    %173 = vector.load %arg17[%c0_87, %c16] : memref<8x290xbf16, #tpu.memory_space<vmem>>, vector<8x256xbf16>
    %174 = vector.broadcast %150 : vector<1x256xbf16> to vector<8x256xbf16>
    %175 = arith.mulf %173, %174 : vector<8x256xbf16>
    %c3 = arith.constant 3 : index
    %c0_88 = arith.constant 0 : index
    %c0_89 = arith.constant 0 : index
    %176 = vector.load %arg12[%c3, %c0_88, %c0_89] : memref<9x4x8xbf16, #tpu.memory_space<vmem>>, vector<1x4x8xbf16>
    %177 = vector.shape_cast %176 : vector<1x4x8xbf16> to vector<4x8xbf16>
    %cst_90 = arith.constant dense<0.000000e+00> : vector<4x256xf32>
    %178 = tpu.matmul %177, %175, %cst_90 {dimension_numbers = #tpu.dot_dimension_numbers<[1], [0], [0], [1], [0, 0, 1, 1], [], []>} : vector<4x8xbf16>, vector<8x256xbf16>, vector<4x256xf32> -> vector<4x256xf32>
    %179 = arith.addf %172, %178 : vector<4x256xf32>
    %c0_91 = arith.constant 0 : index
    %c17_92 = arith.constant 17 : index
    %180 = vector.load %arg17[%c0_91, %c17_92] : memref<8x290xbf16, #tpu.memory_space<vmem>>, vector<8x256xbf16>
    %c4_93 = arith.constant 4 : index
    %c0_94 = arith.constant 0 : index
    %c0_95 = arith.constant 0 : index
    %181 = vector.load %arg12[%c4_93, %c0_94, %c0_95] : memref<9x4x8xbf16, #tpu.memory_space<vmem>>, vector<1x4x8xbf16>
    %182 = vector.shape_cast %181 : vector<1x4x8xbf16> to vector<4x8xbf16>
    %cst_96 = arith.constant dense<0.000000e+00> : vector<4x256xf32>
    %183 = tpu.matmul %182, %180, %cst_96 {dimension_numbers = #tpu.dot_dimension_numbers<[1], [0], [0], [1], [0, 0, 1, 1], [], []>} : vector<4x8xbf16>, vector<8x256xbf16>, vector<4x256xf32> -> vector<4x256xf32>
    %184 = arith.addf %179, %183 : vector<4x256xf32>
    %c0_97 = arith.constant 0 : index
    %c18 = arith.constant 18 : index
    %185 = vector.load %arg17[%c0_97, %c18] : memref<8x290xbf16, #tpu.memory_space<vmem>>, vector<8x256xbf16>
    %186 = vector.broadcast %151 : vector<1x256xbf16> to vector<8x256xbf16>
    %187 = arith.mulf %185, %186 : vector<8x256xbf16>
    %c5 = arith.constant 5 : index
    %c0_98 = arith.constant 0 : index
    %c0_99 = arith.constant 0 : index
    %188 = vector.load %arg12[%c5, %c0_98, %c0_99] : memref<9x4x8xbf16, #tpu.memory_space<vmem>>, vector<1x4x8xbf16>
    %189 = vector.shape_cast %188 : vector<1x4x8xbf16> to vector<4x8xbf16>
    %cst_100 = arith.constant dense<0.000000e+00> : vector<4x256xf32>
    %190 = tpu.matmul %189, %187, %cst_100 {dimension_numbers = #tpu.dot_dimension_numbers<[1], [0], [0], [1], [0, 0, 1, 1], [], []>} : vector<4x8xbf16>, vector<8x256xbf16>, vector<4x256xf32> -> vector<4x256xf32>
    %191 = arith.addf %184, %190 : vector<4x256xf32>
    %c0_101 = arith.constant 0 : index
    %c32 = arith.constant 32 : index
    %192 = vector.load %arg17[%c0_101, %c32] : memref<8x290xbf16, #tpu.memory_space<vmem>>, vector<8x256xbf16>
    %193 = vector.broadcast %150 : vector<1x256xbf16> to vector<8x256xbf16>
    %194 = arith.mulf %192, %193 : vector<8x256xbf16>
    %c6 = arith.constant 6 : index
    %c0_102 = arith.constant 0 : index
    %c0_103 = arith.constant 0 : index
    %195 = vector.load %arg12[%c6, %c0_102, %c0_103] : memref<9x4x8xbf16, #tpu.memory_space<vmem>>, vector<1x4x8xbf16>
    %196 = vector.shape_cast %195 : vector<1x4x8xbf16> to vector<4x8xbf16>
    %cst_104 = arith.constant dense<0.000000e+00> : vector<4x256xf32>
    %197 = tpu.matmul %196, %194, %cst_104 {dimension_numbers = #tpu.dot_dimension_numbers<[1], [0], [0], [1], [0, 0, 1, 1], [], []>} : vector<4x8xbf16>, vector<8x256xbf16>, vector<4x256xf32> -> vector<4x256xf32>
    %198 = arith.addf %191, %197 : vector<4x256xf32>
    %c0_105 = arith.constant 0 : index
    %c33 = arith.constant 33 : index
    %199 = vector.load %arg17[%c0_105, %c33] : memref<8x290xbf16, #tpu.memory_space<vmem>>, vector<8x256xbf16>
    %c7 = arith.constant 7 : index
    %c0_106 = arith.constant 0 : index
    %c0_107 = arith.constant 0 : index
    %200 = vector.load %arg12[%c7, %c0_106, %c0_107] : memref<9x4x8xbf16, #tpu.memory_space<vmem>>, vector<1x4x8xbf16>
    %201 = vector.shape_cast %200 : vector<1x4x8xbf16> to vector<4x8xbf16>
    %cst_108 = arith.constant dense<0.000000e+00> : vector<4x256xf32>
    %202 = tpu.matmul %201, %199, %cst_108 {dimension_numbers = #tpu.dot_dimension_numbers<[1], [0], [0], [1], [0, 0, 1, 1], [], []>} : vector<4x8xbf16>, vector<8x256xbf16>, vector<4x256xf32> -> vector<4x256xf32>
    %203 = arith.addf %198, %202 : vector<4x256xf32>
    %c0_109 = arith.constant 0 : index
    %c34 = arith.constant 34 : index
    %204 = vector.load %arg17[%c0_109, %c34] : memref<8x290xbf16, #tpu.memory_space<vmem>>, vector<8x256xbf16>
    %205 = vector.broadcast %151 : vector<1x256xbf16> to vector<8x256xbf16>
    %206 = arith.mulf %204, %205 : vector<8x256xbf16>
    %c8 = arith.constant 8 : index
    %c0_110 = arith.constant 0 : index
    %c0_111 = arith.constant 0 : index
    %207 = vector.load %arg12[%c8, %c0_110, %c0_111] : memref<9x4x8xbf16, #tpu.memory_space<vmem>>, vector<1x4x8xbf16>
    %208 = vector.shape_cast %207 : vector<1x4x8xbf16> to vector<4x8xbf16>
    %cst_112 = arith.constant dense<0.000000e+00> : vector<4x256xf32>
    %209 = tpu.matmul %208, %206, %cst_112 {dimension_numbers = #tpu.dot_dimension_numbers<[1], [0], [0], [1], [0, 0, 1, 1], [], []>} : vector<4x8xbf16>, vector<8x256xbf16>, vector<4x256xf32> -> vector<4x256xf32>
    %210 = arith.addf %203, %209 : vector<4x256xf32>
    %cst_113 = arith.constant 0.000000e+00 : f32
    %211 = vector.broadcast %cst_113 : f32 to vector<4x256xf32>
    %212 = arith.maximumf %210, %211 : vector<4x256xf32>
    %213 = arith.truncf %212 : vector<4x256xf32> to vector<4x256xbf16>
    %c0_114 = arith.constant 0 : index
    %c17_115 = arith.constant 17 : index
    %214 = vector.load %arg18[%c0_114, %c17_115] : memref<4x290xbf16, #tpu.memory_space<vmem>>, vector<4x256xbf16>
    tpu.vector_store %arg18[%c0_114, %c17_115], %213 {strides = array<i32>} : memref<4x290xbf16, #tpu.memory_space<vmem>>, vector<4x256xbf16>,
    %c0_116 = arith.constant 0 : index
    %c0_117 = arith.constant 0 : index
    %215 = vector.load %arg15[%c0_116, %c0_117] : memref<4x1xf32, #tpu.memory_space<vmem>>, vector<4x1xf32>
    %c0_118 = arith.constant 0 : index
    %c0_119 = arith.constant 0 : index
    %216 = vector.load %arg18[%c0_118, %c0_119] : memref<4x290xbf16, #tpu.memory_space<vmem>>, vector<4x256xbf16>
    %217 = vector.broadcast %150 : vector<1x256xbf16> to vector<4x256xbf16>
    %218 = arith.mulf %216, %217 : vector<4x256xbf16>
    %c0_120 = arith.constant 0 : index
    %c0_121 = arith.constant 0 : index
    %c0_122 = arith.constant 0 : index
    %219 = vector.load %arg14[%c0_120, %c0_121, %c0_122] : memref<9x4x4xbf16, #tpu.memory_space<vmem>>, vector<1x4x4xbf16>
    %220 = vector.shape_cast %219 : vector<1x4x4xbf16> to vector<4x4xbf16>
    %cst_123 = arith.constant dense<0.000000e+00> : vector<4x256xf32>
    %221 = tpu.matmul %220, %218, %cst_123 {dimension_numbers = #tpu.dot_dimension_numbers<[1], [0], [0], [1], [0, 0, 1, 1], [], []>} : vector<4x4xbf16>, vector<4x256xbf16>, vector<4x256xf32> -> vector<4x256xf32>
    %222 = vector.broadcast %215 : vector<4x1xf32> to vector<4x256xf32>
    %223 = arith.addf %222, %221 : vector<4x256xf32>
    %c0_124 = arith.constant 0 : index
    %c1_125 = arith.constant 1 : index
    %224 = vector.load %arg18[%c0_124, %c1_125] : memref<4x290xbf16, #tpu.memory_space<vmem>>, vector<4x256xbf16>
    %c1_126 = arith.constant 1 : index
    %c0_127 = arith.constant 0 : index
    %c0_128 = arith.constant 0 : index
    %225 = vector.load %arg14[%c1_126, %c0_127, %c0_128] : memref<9x4x4xbf16, #tpu.memory_space<vmem>>, vector<1x4x4xbf16>
    %226 = vector.shape_cast %225 : vector<1x4x4xbf16> to vector<4x4xbf16>
    %cst_129 = arith.constant dense<0.000000e+00> : vector<4x256xf32>
    %227 = tpu.matmul %226, %224, %cst_129 {dimension_numbers = #tpu.dot_dimension_numbers<[1], [0], [0], [1], [0, 0, 1, 1], [], []>} : vector<4x4xbf16>, vector<4x256xbf16>, vector<4x256xf32> -> vector<4x256xf32>
    %228 = arith.addf %223, %227 : vector<4x256xf32>
    %c0_130 = arith.constant 0 : index
    %c2_131 = arith.constant 2 : index
    %229 = vector.load %arg18[%c0_130, %c2_131] : memref<4x290xbf16, #tpu.memory_space<vmem>>, vector<4x256xbf16>
    %230 = vector.broadcast %151 : vector<1x256xbf16> to vector<4x256xbf16>
    %231 = arith.mulf %229, %230 : vector<4x256xbf16>
    %c2_132 = arith.constant 2 : index
    %c0_133 = arith.constant 0 : index
    %c0_134 = arith.constant 0 : index
    %232 = vector.load %arg14[%c2_132, %c0_133, %c0_134] : memref<9x4x4xbf16, #tpu.memory_space<vmem>>, vector<1x4x4xbf16>
    %233 = vector.shape_cast %232 : vector<1x4x4xbf16> to vector<4x4xbf16>
    %cst_135 = arith.constant dense<0.000000e+00> : vector<4x256xf32>
    %234 = tpu.matmul %233, %231, %cst_135 {dimension_numbers = #tpu.dot_dimension_numbers<[1], [0], [0], [1], [0, 0, 1, 1], [], []>} : vector<4x4xbf16>, vector<4x256xbf16>, vector<4x256xf32> -> vector<4x256xf32>
    %235 = arith.addf %228, %234 : vector<4x256xf32>
    %c0_136 = arith.constant 0 : index
    %c16_137 = arith.constant 16 : index
    %236 = vector.load %arg18[%c0_136, %c16_137] : memref<4x290xbf16, #tpu.memory_space<vmem>>, vector<4x256xbf16>
    %237 = vector.broadcast %150 : vector<1x256xbf16> to vector<4x256xbf16>
    %238 = arith.mulf %236, %237 : vector<4x256xbf16>
    %c3_138 = arith.constant 3 : index
    %c0_139 = arith.constant 0 : index
    %c0_140 = arith.constant 0 : index
    %239 = vector.load %arg14[%c3_138, %c0_139, %c0_140] : memref<9x4x4xbf16, #tpu.memory_space<vmem>>, vector<1x4x4xbf16>
    %240 = vector.shape_cast %239 : vector<1x4x4xbf16> to vector<4x4xbf16>
    %cst_141 = arith.constant dense<0.000000e+00> : vector<4x256xf32>
    %241 = tpu.matmul %240, %238, %cst_141 {dimension_numbers = #tpu.dot_dimension_numbers<[1], [0], [0], [1], [0, 0, 1, 1], [], []>} : vector<4x4xbf16>, vector<4x256xbf16>, vector<4x256xf32> -> vector<4x256xf32>
    %242 = arith.addf %235, %241 : vector<4x256xf32>
    %c0_142 = arith.constant 0 : index
    %c17_143 = arith.constant 17 : index
    %243 = vector.load %arg18[%c0_142, %c17_143] : memref<4x290xbf16, #tpu.memory_space<vmem>>, vector<4x256xbf16>
    %c4_144 = arith.constant 4 : index
    %c0_145 = arith.constant 0 : index
    %c0_146 = arith.constant 0 : index
    %244 = vector.load %arg14[%c4_144, %c0_145, %c0_146] : memref<9x4x4xbf16, #tpu.memory_space<vmem>>, vector<1x4x4xbf16>
    %245 = vector.shape_cast %244 : vector<1x4x4xbf16> to vector<4x4xbf16>
    %cst_147 = arith.constant dense<0.000000e+00> : vector<4x256xf32>
    %246 = tpu.matmul %245, %243, %cst_147 {dimension_numbers = #tpu.dot_dimension_numbers<[1], [0], [0], [1], [0, 0, 1, 1], [], []>} : vector<4x4xbf16>, vector<4x256xbf16>, vector<4x256xf32> -> vector<4x256xf32>
    %247 = arith.addf %242, %246 : vector<4x256xf32>
    %c0_148 = arith.constant 0 : index
    %c18_149 = arith.constant 18 : index
    %248 = vector.load %arg18[%c0_148, %c18_149] : memref<4x290xbf16, #tpu.memory_space<vmem>>, vector<4x256xbf16>
    %249 = vector.broadcast %151 : vector<1x256xbf16> to vector<4x256xbf16>
    %250 = arith.mulf %248, %249 : vector<4x256xbf16>
    %c5_150 = arith.constant 5 : index
    %c0_151 = arith.constant 0 : index
    %c0_152 = arith.constant 0 : index
    %251 = vector.load %arg14[%c5_150, %c0_151, %c0_152] : memref<9x4x4xbf16, #tpu.memory_space<vmem>>, vector<1x4x4xbf16>
    %252 = vector.shape_cast %251 : vector<1x4x4xbf16> to vector<4x4xbf16>
    %cst_153 = arith.constant dense<0.000000e+00> : vector<4x256xf32>
    %253 = tpu.matmul %252, %250, %cst_153 {dimension_numbers = #tpu.dot_dimension_numbers<[1], [0], [0], [1], [0, 0, 1, 1], [], []>} : vector<4x4xbf16>, vector<4x256xbf16>, vector<4x256xf32> -> vector<4x256xf32>
    %254 = arith.addf %247, %253 : vector<4x256xf32>
    %c0_154 = arith.constant 0 : index
    %c32_155 = arith.constant 32 : index
    %255 = vector.load %arg18[%c0_154, %c32_155] : memref<4x290xbf16, #tpu.memory_space<vmem>>, vector<4x256xbf16>
    %256 = vector.broadcast %150 : vector<1x256xbf16> to vector<4x256xbf16>
    %257 = arith.mulf %255, %256 : vector<4x256xbf16>
    %c6_156 = arith.constant 6 : index
    %c0_157 = arith.constant 0 : index
    %c0_158 = arith.constant 0 : index
    %258 = vector.load %arg14[%c6_156, %c0_157, %c0_158] : memref<9x4x4xbf16, #tpu.memory_space<vmem>>, vector<1x4x4xbf16>
    %259 = vector.shape_cast %258 : vector<1x4x4xbf16> to vector<4x4xbf16>
    %cst_159 = arith.constant dense<0.000000e+00> : vector<4x256xf32>
    %260 = tpu.matmul %259, %257, %cst_159 {dimension_numbers = #tpu.dot_dimension_numbers<[1], [0], [0], [1], [0, 0, 1, 1], [], []>} : vector<4x4xbf16>, vector<4x256xbf16>, vector<4x256xf32> -> vector<4x256xf32>
    %261 = arith.addf %254, %260 : vector<4x256xf32>
    %c0_160 = arith.constant 0 : index
    %c33_161 = arith.constant 33 : index
    %262 = vector.load %arg18[%c0_160, %c33_161] : memref<4x290xbf16, #tpu.memory_space<vmem>>, vector<4x256xbf16>
    %c7_162 = arith.constant 7 : index
    %c0_163 = arith.constant 0 : index
    %c0_164 = arith.constant 0 : index
    %263 = vector.load %arg14[%c7_162, %c0_163, %c0_164] : memref<9x4x4xbf16, #tpu.memory_space<vmem>>, vector<1x4x4xbf16>
    %264 = vector.shape_cast %263 : vector<1x4x4xbf16> to vector<4x4xbf16>
    %cst_165 = arith.constant dense<0.000000e+00> : vector<4x256xf32>
    %265 = tpu.matmul %264, %262, %cst_165 {dimension_numbers = #tpu.dot_dimension_numbers<[1], [0], [0], [1], [0, 0, 1, 1], [], []>} : vector<4x4xbf16>, vector<4x256xbf16>, vector<4x256xf32> -> vector<4x256xf32>
    %266 = arith.addf %261, %265 : vector<4x256xf32>
    %c0_166 = arith.constant 0 : index
    %c34_167 = arith.constant 34 : index
    %267 = vector.load %arg18[%c0_166, %c34_167] : memref<4x290xbf16, #tpu.memory_space<vmem>>, vector<4x256xbf16>
    %268 = vector.broadcast %151 : vector<1x256xbf16> to vector<4x256xbf16>
    %269 = arith.mulf %267, %268 : vector<4x256xbf16>
    %c8_168 = arith.constant 8 : index
    %c0_169 = arith.constant 0 : index
    %c0_170 = arith.constant 0 : index
    %270 = vector.load %arg14[%c8_168, %c0_169, %c0_170] : memref<9x4x4xbf16, #tpu.memory_space<vmem>>, vector<1x4x4xbf16>
    %271 = vector.shape_cast %270 : vector<1x4x4xbf16> to vector<4x4xbf16>
    %cst_171 = arith.constant dense<0.000000e+00> : vector<4x256xf32>
    %272 = tpu.matmul %271, %269, %cst_171 {dimension_numbers = #tpu.dot_dimension_numbers<[1], [0], [0], [1], [0, 0, 1, 1], [], []>} : vector<4x4xbf16>, vector<4x256xbf16>, vector<4x256xf32> -> vector<4x256xf32>
    %273 = arith.addf %266, %272 : vector<4x256xf32>
    %cst_172 = arith.constant 0.000000e+00 : f32
    %274 = vector.broadcast %cst_172 : f32 to vector<4x256xf32>
    %275 = arith.maximumf %273, %274 : vector<4x256xf32>
    %c0_173 = arith.constant 0 : index
    %c0_174 = arith.constant 0 : index
    %c0_175 = arith.constant 0 : index
    %276 = vector.load %arg16[%c0_173, %c0_174, %c0_175] : memref<1x4x256xf32, #tpu.memory_space<vmem>>, vector<1x4x256xf32>
    %277 = vector.shape_cast %276 : vector<1x4x256xf32> to vector<4x256xf32>
    %278 = vector.shape_cast %275 : vector<4x256xf32> to vector<1x4x256xf32>
    tpu.vector_store %arg16[%c0_173, %c0_174, %c0_175], %278 {strides = array<i32>} : memref<1x4x256xf32, #tpu.memory_space<vmem>>, vector<1x4x256xf32>,
    return
  }
  func.func @transform_0(%arg0: i32) -> (i32, i32, i32) {
    %c0_i32 = arith.constant 0 : i32
    %c0_i32_0 = arith.constant 0 : i32
    %c0_i32_1 = arith.constant 0 : i32
    return %arg0, %c0_i32, %c0_i32_0 : i32, i32, i32
  }
  func.func @transform_1(%arg0: i32) -> (i32, i32, i32) {
    %c0_i32 = arith.constant 0 : i32
    %c0_i32_0 = arith.constant 0 : i32
    %c0_i32_1 = arith.constant 0 : i32
    return %arg0, %c0_i32, %c0_i32_0 : i32, i32, i32
  }
  func.func @transform_2(%arg0: i32) -> (i32, i32) {
    %c0_i32 = arith.constant 0 : i32
    %c0_i32_0 = arith.constant 0 : i32
    %c0_i32_1 = arith.constant 0 : i32
    return %c0_i32, %c0_i32_0 : i32, i32
  }
  func.func @transform_3(%arg0: i32) -> (i32, i32) {
    %c0_i32 = arith.constant 0 : i32
    %c0_i32_0 = arith.constant 0 : i32
    %c0_i32_1 = arith.constant 0 : i32
    return %c0_i32, %c0_i32_0 : i32, i32
  }
  func.func @transform_4(%arg0: i32) -> (i32, i32) {
    %c0_i32 = arith.constant 0 : i32
    %c0_i32_0 = arith.constant 0 : i32
    %c0_i32_1 = arith.constant 0 : i32
    return %c0_i32, %c0_i32_0 : i32, i32
  }
  func.func @transform_5(%arg0: i32) -> (i32, i32) {
    %c0_i32 = arith.constant 0 : i32
    %c0_i32_0 = arith.constant 0 : i32
    %c0_i32_1 = arith.constant 0 : i32
    return %c0_i32, %c0_i32_0 : i32, i32
  }
  func.func @transform_6(%arg0: i32) -> (i32, i32) {
    %c0_i32 = arith.constant 0 : i32
    %c0_i32_0 = arith.constant 0 : i32
    %c0_i32_1 = arith.constant 0 : i32
    return %c0_i32, %c0_i32_0 : i32, i32
  }
  func.func @transform_7(%arg0: i32) -> (i32, i32) {
    %c0_i32 = arith.constant 0 : i32
    %c0_i32_0 = arith.constant 0 : i32
    %c0_i32_1 = arith.constant 0 : i32
    return %c0_i32, %c0_i32_0 : i32, i32
  }
  func.func @transform_8(%arg0: i32) -> (i32, i32) {
    %c0_i32 = arith.constant 0 : i32
    %c0_i32_0 = arith.constant 0 : i32
    %c0_i32_1 = arith.constant 0 : i32
    return %c0_i32, %c0_i32_0 : i32, i32
  }
  func.func @transform_9(%arg0: i32) -> (i32, i32) {
    %c0_i32 = arith.constant 0 : i32
    %c0_i32_0 = arith.constant 0 : i32
    %c0_i32_1 = arith.constant 0 : i32
    return %c0_i32, %c0_i32_0 : i32, i32
  }
  func.func @transform_10(%arg0: i32) -> (i32, i32) {
    %c0_i32 = arith.constant 0 : i32
    %c0_i32_0 = arith.constant 0 : i32
    %c0_i32_1 = arith.constant 0 : i32
    return %c0_i32, %c0_i32_0 : i32, i32
  }
  func.func @transform_11(%arg0: i32) -> (i32, i32, i32) {
    %c0_i32 = arith.constant 0 : i32
    %c0_i32_0 = arith.constant 0 : i32
    %c0_i32_1 = arith.constant 0 : i32
    %c0_i32_2 = arith.constant 0 : i32
    return %c0_i32, %c0_i32_0, %c0_i32_1 : i32, i32, i32
  }
  func.func @transform_12(%arg0: i32) -> (i32, i32) {
    %c0_i32 = arith.constant 0 : i32
    %c0_i32_0 = arith.constant 0 : i32
    %c0_i32_1 = arith.constant 0 : i32
    return %c0_i32, %c0_i32_0 : i32, i32
  }
  func.func @transform_13(%arg0: i32) -> (i32, i32, i32) {
    %c0_i32 = arith.constant 0 : i32
    %c0_i32_0 = arith.constant 0 : i32
    %c0_i32_1 = arith.constant 0 : i32
    %c0_i32_2 = arith.constant 0 : i32
    return %c0_i32, %c0_i32_0, %c0_i32_1 : i32, i32, i32
  }
  func.func @transform_14(%arg0: i32) -> (i32, i32) {
    %c0_i32 = arith.constant 0 : i32
    %c0_i32_0 = arith.constant 0 : i32
    %c0_i32_1 = arith.constant 0 : i32
    return %c0_i32, %c0_i32_0 : i32, i32
  }
  func.func @transform_15(%arg0: i32) -> (i32, i32, i32) {
    %c0_i32 = arith.constant 0 : i32
    %c0_i32_0 = arith.constant 0 : i32
    %c0_i32_1 = arith.constant 0 : i32
    return %arg0, %c0_i32, %c0_i32_0 : i32, i32, i32
  }
}

</mosaic_0001>

<bundles_post_ra>
// kernel: up_forward.1
= control target key start
LH: loop header
LB: loop body
LE: loop exit
PB: predicated region body
PF: predicated region fallthrough
CT: control target
= control target key end

     0   :  { %s2997_s20 = smov 0   ;;  %s3432_s0 = inlined_call_operand.vmem [shape: bf16[2,32,8], index: 0, kind: input, shape index: {}]   ;;  %s3433_s1 = inlined_call_operand.vmem [shape: f32[2,4,256], index: 1, kind: input, shape index: {}]   ;;  %s3434_s2 = inlined_call_operand.vmem [shape: bf16[8,16], index: 2, kind: input, shape index: {}]   ;;  %s3435_s3 = inlined_call_operand.vmem [shape: bf16[1,256], index: 3, kind: input, shape index: {}]   ;;  %s3436_s4 = inlined_call_operand.vmem [shape: bf16[1,256], index: 4, kind: input, shape index: {}]   ;;  %s3437_s5 = inlined_call_operand.vmem [shape: bf16[2,4], index: 5, kind: input, shape index: {}]   ;;  %s3438_s6 = inlined_call_operand.vmem [shape: f32[2,1], index: 6, kind: input, shape index: {}]   ;;  %s3439_s7 = inlined_call_operand.vmem [shape: bf16[2,4], index: 7, kind: input, shape index: {}]   ;;  %s3440_s8 = inlined_call_operand.vmem [shape: f32[2,1], index: 8, kind: input, shape index: {}]   ;;  %s3441_s9 = inlined_call_operand.vmem [shape: f32[2,1], index: 9, kind: input, shape index: {}]   ;;  %s3442_s10 = inlined_call_operand.<no memory space> [shape: f32[1,1], index: 10, kind: input, shape index: {}]   ;;  %s3443_s11 = inlined_call_operand.vmem [shape: bf16[9,4,8], index: 11, kind: input, shape index: {}]   ;;  %s3444_s12 = inlined_call_operand.vmem [shape: f32[4,1], index: 12, kind: input, shape index: {}]   ;;  %s3445_s13 = inlined_call_operand.vmem [shape: bf16[9,4,4], index: 13, kind: input, shape index: {}]   ;;  %s3446_s14 = inlined_call_operand.vmem [shape: f32[4,1], index: 14, kind: input, shape index: {}]   ;;  %s3447_s15 = inlined_call_operand.vmem [shape: f32[2,4,256], index: 15, kind: output, shape index: {}]  }
   0x1   :  { %v20_v0 = vstv %s3442_s10 }
   0x2   :  { %21 = vst [vmem:[#allocation4] sm:$0x1] %v20_v0 }
   0x3 LB: > { %s2607_s21 = sadd.s32 4294967295, %s2892_s20   ;;  %p2611_p0 = scmp.ge.s32.totalorder %s2892_s20, 1  ;;  %s2892_s20 = sphi %s2997_s20, %s27_s20  }
   0x4   : > { %p449_p1 = scmp.lt.s32.totalorder %s2892_s20, 3 }
   0x6   : > { %p450_p2 = pnand %p2611_p0, %p449_p1 }
   0x7   : > { %v531_v1 = vld [vmem:[%s3434_s2] sm:$0xf] (!%p450_p2)  ;;  %vm549_vm0 = vcmask (!%p450_p2), 1043456   ;;  %p502_p3 = scmp.lt.s32.totalorder (!%p450_p2), %s2607_s21, 1  ;;  %vm542_vm1 = vcmask (!%p450_p2), 64512   ;;  %v2894_v5 = vmov (!%p450_p2), 0  }
   0x8   : > { %453 = sbr.rel (%p450_p2) target bundleno = 1875 (0x753), region = 80  ;;  %2802 = vmatprep.subr.msk.bf16.mxu0 (!%p450_p2), %vm549_vm0, %v531_v1  ;;  %v551_v2 = vsel (!%p450_p2), %vm549_vm0, %v531_v1, 0  ;;  %2866 = vset.pattern.permute.xlu1 (!%p450_p2), %v2894_v5  ;;  %s2895_s27 = smov (!%p450_p2), 16   ;;  %vm519_vm2 = vcmask (!%p450_p2), 134144   ;;  %vm521_vm3 = vcmask (!%p450_p2), 273544   ;;  %vm751_vm4 = vcmask (!%p450_p2), 130048  }
   0x9   : > { %2721 = vmatpush3.bf16.msra.mxu0 (!%p450_p2), %v551_v2  ;;  %824 = vmatprep.mubr.bf16.mxu1 (!%p450_p2), %v2894_v5  ;;  %s2896_s28 = smov (!%p450_p2), 32   ;;  %s2897_s29 = smov (!%p450_p2), 48   ;;  %520 = vst.msk [vmem:[#allocation2] sm:$0xf] (!%p450_p2), %vm519_vm2, %v2894_v5  ;;  %vm753_vm5 = vcmask (!%p450_p2), 261120   ;;  %vm755_vm6 = vcmask (!%p450_p2), 392192  }
   0xa   : > { %2867 = vset.pattern.permute.xlu0 (!%p450_p2), %v2894_v5  ;;  %s2898_s30 = smov (!%p450_p2), 80   ;;  %s2899_s16 = smov (!%p450_p2), 64   ;;  %522 = vst.msk [vmem:[#allocation2 + $0x8] sm:$0xf] (!%p450_p2), %vm521_vm3, %v2894_v5  ;;  %vm757_vm7 = vcmask (!%p450_p2), 523264   ;;  %vm759_vm8 = vcmask (!%p450_p2), 654336  }
   0xb   : > { %s2900_s17 = smov (!%p450_p2), 112   ;;  %s3449_s18 = smov (!%p450_p2), 96   ;;  %vm3461_vm9 = vcmask (!%p450_p2), 785408   ;;  %vm3457_vm10 = vcmask (!%p450_p2), 916480   ;;  %vm785_vm11 = vcmask (!%p450_p2), 1041408   ;;  %vm781_vm12 = vcmask (!%p450_p2), 31744  }
   0xc   : > { %s2902_s23 = smov (!%p450_p2), 17   ;;  %vm984_vm13 = vcmask (!%p450_p2), 1043594   ;;  %vm985_vm14 = vcmask (!%p450_p2), 1047558   ;;  %vm963_vm15 = vcmask (!%p450_p2), 138240   ;;  %vm988_vm2 = vcmask (!%p450_p2), 134146   ;;  %s2904_s19 = smov (!%p450_p2), 2  }
   0xd   : > { %vm986_vm3 = vmor (!%p450_p2), %vm985_vm14, %vm984_vm13  ;;  %s2905_s22 = smov (!%p450_p2), 18   ;;  %vm1219_vm14 = vcmask (!%p450_p2), 15360   ;;  %s3453_s24 = smov (!%p450_p2), 110  }
   0xe   : > { %s3451_s25 = smov (!%p450_p2), 95  }
   0xf   : > { %s3478_s21 = smov (!%p502_p3, %s2607_s21), 1 }
  0x10   : > { %s2712_s10 = sshll.u32 %s3478_s21, 4 }
  0x11   : > { %s506_s26 = scalar_lea.vmem %s3432_s0, %s2712_s10  ;;  %s2906_s10 = smov 127  }
  0x12   : > { %v2868_v3 = vld [vmem:[%s506_s26] sm:$0xff]   ;;  %v2869_v4 = vld [vmem:[%s506_s26 + $0x8] sm:$0xff]   ;;  %s3448_s26 = sshll.u32 %s3478_s21, 3 }
  0x13   : > { %2722 = vmatprep.mubr.msk.bf16.mxu0 %vm542_vm1, %v2868_v3 }
  0x14   : > { %2723 = vmatmul.mubr.msk.bf16.vlgmr.msra.gmra.mrb[0].mxu0 %vm542_vm1, %v2869_v4 }
  0x15   : > { %1085 = vmatprep.mubr.bf16.mxu0 %v2894_v5 }
  0xe7   : > { %v3022_v6 = vpop.f32.mrb[0].mxu0 }
  0xe8   : > { %v3024_v7 = vpop.f32.mrb[1].mxu0  ;;  %v651_v8 = vmul.f32 0.2, %v3022_v6  ;;  %v650_v11 = vmul.f32 0.8, %v3022_v6 }
  0xe9   : > { %v3027_v9 = vpop.f32.mrb[2].mxu0  ;;  %v603_v10 = vmul.f32 0.46666667, %v3024_v7  ;;  %v602_v13 = vmul.f32 0.53333336, %v3024_v7 }
  0xea   : > { %v590_v12 = vpop.f32.mrb[3].mxu0  ;;  %v653_v14 = vrot.slane %v651_v8, 4  ;;  %v609_v15 = vmul.f32 0.93333334, %v3024_v7  ;;  %v608_v17 = vmul.f32 0.06666667, %v3024_v7 }
  0xeb   : > { %v605_v16 = vrot.slane %v603_v10, 4  ;;  %v657_v18 = vmul.f32 0.6666667, %v3022_v6  ;;  %v656_v21 = vmul.f32 0.33333334, %v3022_v6 }
  0xec   : > { %v655_v19 = vadd.f32 %v653_v14, %v650_v11  ;;  %v611_v20 = vrot.slane %v609_v15, 4  ;;  %v615_v22 = vmul.f32 0.4, %v590_v12  ;;  %v614_v25 = vmul.f32 0.6, %v3024_v7 }
  0xed   : > { %v607_v23 = vadd.f32 %v605_v16, %v602_v13  ;;  %v659_v24 = vrot.slane %v657_v18, 4  ;;  %v663_v26 = vmul.f32 0.13333334, %v3027_v9  ;;  %v662_v29 = vmul.f32 0.8666667, %v3022_v6 }
  0xee   : > { %v613_v27 = vadd.f32 %v611_v20, %v608_v17  ;;  %v617_v28 = vrot.slane %v615_v22, 4  ;;  %v627_v30 = vmul.f32 0.33333334, %v590_v12  ;;  %v626_v34 = vmul.f32 0.6666667, %v590_v12 }
  0xef   : > { %v2831_v31 = vpack.i.bf16 %v655_v19, %v607_v23  ;;  %v661_v32 = vadd.f32 %v659_v24, %v656_v21  ;;  %v665_v33 = vrot.slane %v663_v26, 4  ;;  %v674_v37 = vmul.f32 0.93333334, %v3027_v9  ;;  %v839_v20 = vld [vmem:[%s3440_s8] sm:$0x3] }
  0xf0   : > { %v619_v35 = vadd.f32 %v617_v28, %v614_v25  ;;  %v629_v36 = vrot.slane %v627_v30, 4  ;;  %v675_v38 = vmul.f32 0.06666667, %v3027_v9  ;;  %v620_v41 = vmul.f32 0.13333334, %v3024_v7 }
  0xf1   : > { %2832 = vrot.lane.b32.xlu0 %v2831_v31, %s2895_s27  ;;  %v2836_v39 = vpack.i.bf16 %v661_v32, %v613_v27  ;;  %v667_v40 = vadd.f32 %v665_v33, %v662_v29  ;;  %v621_v42 = vmul.f32 0.8666667, %v590_v12  ;;  %v669_v46 = vmul.f32 0.6, %v3027_v9 }
  0xf2   : > { %v695_v43 = vrot.slane %v619_v35, 4  ;;  %v631_v44 = vadd.f32 %v629_v36, %v626_v34  ;;  %v677_v45 = vrot.slane %v675_v38, 4  ;;  %v638_v49 = vmul.f32 0.73333335, %v590_v12 }
  0xf3   : > { %v729_v47 = vrot.slane %v667_v40, 4  ;;  %v623_v48 = vrot.slane %v621_v42, 4  ;;  %v639_v50 = vmul.f32 0.26666668, %v3022_v6  ;;  %v668_v52 = vmul.f32 0.4, %v3022_v6 }
  0xf4   : > { %v679_v51 = vadd.f32 %v677_v45, %v674_v37  ;;  %v671_v53 = vrot.slane %v669_v46, 4  ;;  %v633_v54 = vmul.f32 0.8, %v590_v12  ;;  %v632_v58 = vmul.f32 0.2, %v590_v12 }
  0xf5   : > { %2837 = vrot.lane.b32.xlu0 %v2836_v39, %s2896_s28  ;;  %v2846_v55 = vpack.i.bf16 %v729_v47, %v695_v43  ;;  %v625_v56 = vadd.f32 %v623_v48, %v620_v41  ;;  %v641_v57 = vrot.slane %v639_v50, 4  ;;  %v681_v62 = vmul.f32 0.53333336, %v3027_v9 }
  0xf6   : > { %v2841_v59 = vpack.i.bf16 %v679_v51, %v631_v44  ;;  %v673_v60 = vadd.f32 %v671_v53, %v668_v52  ;;  %v635_v61 = vrot.slane %v633_v54, 4  ;;  %v645_v1 = vmul.f32 0.73333335, %v3022_v6  ;;  %v775_v6 = vld [vmem:[%s3438_s6] sm:$0x3] }
  0xf7   : > { %2847 = vrot.lane.b32.xlu1 %v2846_v55, %s2897_s29  ;;  %v700_v63 = vrot.slane %v625_v56, 4  ;;  %v643_v0 = vadd.f32 %v641_v57, %v638_v49  ;;  %v644_v2 = vmul.f32 0.26666668, %v590_v12  ;;  %v680_v8 = vmul.f32 0.46666667, %v3027_v9  ;;  %s2907_s29 = smov 126  }
  0xf8   : > { %v734_v3 = vrot.slane %v673_v60, 4  ;;  %v637_v4 = vadd.f32 %v635_v61, %v632_v58  ;;  %v683_v10 = vrot.slane %v681_v62, 4  ;;  %v747_v13 = vrot.slane %v3027_v9, 4  ;;  %v899_v9 = vld [vmem:[%s3441_s9] sm:$0x3] }
  0xf9   : > { %2842 = vrot.lane.b32.xlu0 %v2841_v59, %s2898_s30  ;;  %v713_v11 = vrot.slane %v643_v0, 4  ;;  %v647_v14 = vrot.slane %v645_v1, 4  ;;  %v921_v12 = vld [vmem:[#allocation4] sm:$0x1]  ;;  %v774_v1 = vld [vmem:[%s3437_s5] sm:$0x1] }
  0xfa   : > { %v2851_v15 = vpack.i.bf16 %v734_v3, %v700_v63  ;;  %v685_v16 = vadd.f32 %v683_v10, %v680_v8  ;;  %v833_v3 = vld [vmem:[%s3439_s7] sm:$0x1]  ;;  %s2908_s30 = smov 34  }
  0xfb   : > { %v2861_v17 = vpack.i.bf16 %v747_v13, %v713_v11  ;;  %v649_v18 = vadd.f32 %v647_v14, %v644_v2 }
  0xfc   : > { %2852 = vrot.lane.b32.xlu1 %v2851_v15, %s2899_s16  ;;  %v2856_v19 = vpack.i.bf16 %v685_v16, %v637_v4  ;;  %s511_s16 = scalar_lea.vmem %s3433_s1, %s3448_s26  ;;  %v927_v15 = vlaneseq  ;;  %v2630_v16 = vld.sshfl [vmem:[%s3435_s3] sm:$0x11 pattern:$0x75316420] }
  0xfd   : > { %2862 = vrot.lane.b32.xlu0 %v2861_v17, %s2900_s17  ;;  %v718_v28 = vrot.slane %v649_v18, 4  ;;  %v3075_v43 = vld [vmem:[%s511_s16] sm:$0xff]  ;;  %v2903_v17 = vmov 1966171168   ;;  %s3455_s16 = smov 111  }
  0xfe   : > { %v835_v51 = vcombine.high %v3075_v43, %v3075_v43  ;;  %v837_v58 = vpack.c.bf16 %v3075_v43, %v3075_v43  ;;  %v1004_v18 = vunpack.c.l.s4 %v2903_v17 }
 0x100   : > { %2857 = vrot.lane.b32.xlu1 %v2856_v19, %s3449_s18  ;;  %v838_v62 = vpack.c.bf16 %v835_v51, %v835_v51  ;;  %v849_v2 = vsel %vm785_vm11, %v837_v58, 0  ;;  %v3104_v19 = vshrl.u32 %v927_v15, 7 }
 0x101   : > { %842 = vperm.xlu0 %2867, %v839_v20  }
 0x104   : > { %778 = vperm.xlu1 %2866, %v775_v6   ;;  %v1002_v6 = vcombine.high %v2630_v16, %v2630_v16 }
 0x108   : > { %902 = vperm.xlu1 %2866, %v899_v9   ;;  %v1005_v9 = vunpack.c.0.s8 %v1004_v18 }
 0x10c   : > { %924 = vperm.xlu1 %2866, %v921_v12   ;;  %v1008_v12 = vsub.s32 %v1005_v9, %v3104_v19 }
 0x10e   : > { %v1009_v20 = vrot.slane %v2630_v16, %v1008_v12 }
 0x163   : > { %v2833_v21 = vpop.permute.xlu0 %2832 }
 0x164   : > { %v2835_v23 = vunpack.i.h.bf16 %v2833_v21  ;;  %v2834_v24 = vunpack.i.l.bf16 %v2833_v21  ;;  %v1016_v21 = vrot.slane %v1002_v6, %v1008_v12 }
 0x166   : > { %v752_v30 = vsel %vm751_vm4, %v3024_v7, %v2834_v24  ;;  %v765_v31 = vsel %vm751_vm4, %v718_v28, %v2835_v23  ;;  %v1018_v23 = vpack.i.b16 %v1009_v20, %v1009_v20  ;;  %v1025_v24 = vpack.i.b16 %v1016_v21, %v1016_v21 }
 0x167   : > { %v2838_v22 = vpop.permute.xlu0 %2837 }
 0x168   : > { %v2840_v25 = vunpack.i.h.bf16 %v2838_v22  ;;  %v2839_v26 = vunpack.i.l.bf16 %v2838_v22  ;;  %v929_v22 = vsub.s32 0, %v3104_v19 }
 0x169   : > { %v2848_v27 = vpop.permute.xlu1 %2847 }
 0x16a   : > { %v2850_v32 = vunpack.i.h.bf16 %v2848_v27  ;;  %v2849_v33 = vunpack.i.l.bf16 %v2848_v27  ;;  %v754_v34 = vsel %vm753_vm5, %v752_v30, %v2839_v26  ;;  %v766_v35 = vsel %vm753_vm5, %v765_v31, %v2840_v25 }
 0x16b   : > { %v2843_v29 = vpop.permute.xlu0 %2842  ;;  %v1023_v25 = vrot.slane %v1018_v23, %v929_v22  ;;  %v1030_v26 = vrot.slane %v1025_v24, %v929_v22 }
 0x16c   : > { %v767_v7 = vsel %vm755_vm6, %v766_v35, %v2850_v32  ;;  %v756_v40 = vsel %vm755_vm6, %v754_v34, %v2849_v33  ;;  %v2845_v41 = vunpack.i.h.bf16 %v2843_v29  ;;  %v2844_v42 = vunpack.i.l.bf16 %v2843_v29 }
 0x16d   : > { %vm523_vm6 = vcmask 132096   ;;  %v3110_v27 = vcombine.low %v1023_v25, %v1030_v26 }
 0x16e   : > { %v2853_v36 = vpop.permute.xlu1 %2852  ;;  %524 = vst.msk [vmem:[#allocation3] sm:$0x3] %vm523_vm6, %v2894_v5 }
 0x16f   : > { %v2855_v37 = vunpack.i.h.bf16 %v2853_v36  ;;  %v2854_v38 = vunpack.i.l.bf16 %v2853_v36  ;;  %v2863_v39 = vpop.permute.xlu0 %2862 }
 0x170   : > { %v2865_v46 = vunpack.i.h.bf16 %v2863_v39  ;;  %v2864_v47 = vunpack.i.l.bf16 %v2863_v39 }
 0x171   : > { %v758_v44 = vsel %vm757_vm7, %v756_v40, %v2854_v38  ;;  %v768_v45 = vsel %vm757_vm7, %v767_v7, %v2855_v37  ;;  %vm967_vm7 = vcmask 1041544  }
 0x172   : > { %v2858_v48 = vpop.permute.xlu1 %2857  ;;  %v760_v52 = vsel %vm759_vm8, %v758_v44, %v2844_v42  ;;  %v769_v53 = vsel %vm759_vm8, %v768_v45, %v2845_v41  ;;  %vm968_vm8 = vcmask 1045508  }
 0x173   : > { %v2860_v49 = vunpack.i.h.bf16 %v2858_v48  ;;  %v2859_v50 = vunpack.i.l.bf16 %v2858_v48  ;;  %vm969_vm13 = vmor %vm968_vm8, %vm967_vm7  ;;  %vm1675_vm8 = vcmask 277504  }
 0x175   : > { %v762_v54 = vsel %vm3461_vm9, %v760_v52, %v2859_v50  ;;  %v770_v55 = vsel %vm3461_vm9, %v769_v53, %v2860_v49 }
 0x176   : > { %v764_v56 = vsel %vm3457_vm10, %v762_v54, %v2864_v47  ;;  %v771_v57 = vsel %vm3457_vm10, %v770_v55, %v2865_v46 }
 0x177   : > { %v773_v59 = vpack.c.bf16 %v771_v57, %v771_v57  ;;  %v2716_v60 = vpack.c.bf16 %v771_v57, %v764_v56  ;;  %v772_v61 = vpack.c.bf16 %v764_v56, %v764_v56 }
 0x179   : > { %2622 = vmatprep.subr.msk.bf16.mxu1 %vm785_vm11, %v773_v59  ;;  %v787_v63 = vsel %vm785_vm11, %v772_v61, 0  ;;  %v977_v0 = vrot.slane %v2716_v60, 6 }
 0x17a   : > { %793 = vmatpush1.bf16.msra.mxu1 %v787_v63  ;;  %v2642_v63 = vld.sshfl [vmem:[%s3436_s4] sm:$0x11 pattern:$0x75316420] }
 0x17b   : > { %978 = vrot.lane.b32.xlu1 %v977_v0, %s2902_s23  ;;  %2624 = vmatprep.subr.msk.bf16.mxu1 %vm785_vm11, %v838_v62  ;;  %v1182_v0 = vcombine.high %v2642_v63, %v2642_v63 }
 0x17d   : > { %2623 = vmatmul.mubr.msk.bf16.vlgmr.msra.gmra.mrb[0].mxu1 %vm781_vm12, %v774_v1  ;;  %v1189_v1 = vrot.slane %v2642_v63, %v1008_v12 }
 0x17e   : > { %855 = vmatpush1.bf16.msra.mxu1 %v849_v2  ;;  %886 = vmatprep.mubr.bf16.mxu1 %v2894_v5  ;;  %v1196_v2 = vrot.slane %v1182_v0, %v1008_v12 }
 0x17f   : > { %1298 = vrot.lane.b32.xlu1 %v3110_v27, %s2895_s27 }
 0x180   : > { %v843_v28 = vpop.permute.xlu0 %842 }
 0x183   : > { %v779_v4 = vpop.permute.xlu1 %778  ;;  %1529 = vrot.lane.b32.xlu1 %v3110_v27, %s2896_s28 }
 0x184   : > { %v2726_v29 = vadd.f32 %v843_v28, %v779_v4 }
 0x187   : > { %v903_v8 = vpop.permute.xlu1 %902 }
 0x189   : > { %2625 = vmatmul.mubr.msk.bf16.vlgmr.msra.gmra.mrb[0].mxu1 %vm781_vm12, %v833_v3 }
 0x18a   : > { %1839 = vmatprep.mubr.bf16.mxu1 %v2894_v5 }
 0x18b   : > { %v925_v10 = vpop.permute.xlu1 %924 }
 0x18c   : > { %v930_v52 = vrot.slane %v925_v10, %v929_v22  ;;  %v1198_v10 = vpack.i.b16 %v1189_v1, %v1189_v1 }
 0x18e   : > { %v1203_v15 = vrot.slane %v1198_v10, %v929_v22 }
 0x1ed   : > { %v979_v11 = vpop.permute.xlu1 %978 }
 0x1ee   : > { %v980_v13 = vrot.slane %v979_v11, 4 }
 0x1f0   : > { %v981_v14 = vsel %vm963_vm15, %v980_v13, %v979_v11  ;;  %989 = vst.msk [vmem:[#allocation2 + $0x8] sm:$0xc] %vm988_vm2, %v980_v13  ;;  %v1205_v11 = vpack.i.b16 %v1196_v2, %v1196_v2  ;;  %vm1452_vm2 = vcmask 146432  }
 0x1f1   : > { %987 = vst.msk [vmem:[#allocation2] sm:$0xcc] %vm986_vm3, %v981_v14  ;;  %v1299_v23 = vpop.permute.xlu1 %1298  ;;  %vm1119_vm3 = vcmask 1039360  }
 0x1f2   : > { %v1210_v16 = vrot.slane %v1205_v11, %v929_v22  ;;  %v2636_v11 = vld [vmem:[%s3443_s11 + $0x2] sm:$0x3] }
 0x1f4   : > { %v3123_v18 = vcombine.low %v1203_v15, %v1210_v16 }
 0x25c   : > { %v888_v30 = vpop.f32.mrb[0].mxu1 }
 0x25d   : > { %v2727_v31 = vadd.f32 %v2726_v29, %v888_v30  ;;  %v890_v32 = vpop.f32.mrb[1].mxu1 }
 0x25e   : > { %v2729_v33 = vadd.f32 %v2726_v29, %v890_v32  ;;  %v892_v34 = vpop.f32.mrb[2].mxu1  ;;  %v1300_v29 = vrot.slane %v1299_v23, 4 }
 0x25f   : > { %v897_v35 = vmax.f32 %v2727_v31, 0.0  ;;  %v893_v36 = vpop.f32.mrb[3].mxu1 }
 0x260   : > { %v898_v37 = vmax.f32 %v2729_v33, 0.0 }
 0x261   : > { %v905_v38 = vmul.f32 %v903_v8, %v897_v35 }
 0x262   : > { %v906_v39 = vmul.f32 %v903_v8, %v898_v37  ;;  %v1302_v37 = vsel %vm751_vm4, %v1300_v29, %v1299_v23 }
 0x263   : > { %v907_v7 = vsel %vm785_vm11, %v905_v38, 0.0  ;;  %v1038_v38 = vld [vmem:[%s3443_s11] sm:$0x3] }
 0x264   : > { %v908_v40 = vrot.slane %v907_v7, 4  ;;  %v914_v41 = vsel %vm785_vm11, %v906_v39, 0.0 }
 0x265   : > { %v915_v42 = vrot.slane %v914_v41, 4 }
 0x266   : > { %v909_v44 = vadd.f32 %v908_v40, %v907_v7 }
 0x267   : > { %v916_v45 = vadd.f32 %v915_v42, %v914_v41 }
 0x268   : > { %v910_v46 = vrot.slane %v909_v44, 2 }
 0x269   : > { %v917_v47 = vrot.slane %v916_v45, 2 }
 0x26a   : > { %v911_v48 = vadd.f32 %v910_v46, %v909_v44 }
 0x26b   : > { %v918_v49 = vadd.f32 %v917_v47, %v916_v45 }
 0x26c   : > { %v912_v50 = vrot.slane %v911_v48, 1 }
 0x26d   : > { %v919_v51 = vrot.slane %v918_v49, 1 }
 0x26e   : > { %v913_v53 = vadd.f32 %v912_v50, %v911_v48  ;;  %v1530_v50 = vpop.permute.xlu1 %1529 }
 0x26f   : > { %v920_v54 = vadd.f32 %v919_v51, %v918_v49 }
 0x270   : > { %v931_v55 = vadd.f32 %v930_v52, %v913_v53 }
 0x271   : > { %v932_v56 = vadd.f32 %v930_v52, %v920_v54  ;;  %v1531_v52 = vrot.slane %v1530_v50, 4 }
 0x272   : > { %v2626_v57 = vmul.f32 -1.442695, %v931_v55 }
 0x273   : > { %v2627_v58 = vmul.f32 -1.442695, %v932_v56  ;;  %v1533_v56 = vsel %vm753_vm5, %v1531_v52, %v1530_v50 }
 0x274   : > { %2878 = vpow2.f32 %v2626_v57 }
 0x275   : > { %2880 = vpow2.f32 %v2627_v58 }
 0x27e   : > { %v2879_v59 = vpop.eup %2878 }
 0x27f   : > { %v2881_v60 = vpop.eup %2880  ;;  %v939_v61 = vadd.f32 1.0, %v2879_v59 }
 0x280   : > { %v940_v62 = vadd.f32 1.0, %v2881_v60 }
 0x281   : > { %2882 = vrcp.f32 %v939_v61 }
 0x282   : > { %2884 = vrcp.f32 %v940_v62 }
 0x28b   : > { %v2883_v3 = vpop.eup %2882 }
 0x28c   : > { %v2885_v4 = vpop.eup %2884 }
 0x28d   : > { %v947_v8 = vcombine.low %v2883_v3, %v2885_v4 }
 0x28f   : > { %v949_v13 = vmul.f32 %v947_v8, %v3075_v43 }
 0x291   : > { %v951_v14 = vcombine.high %v949_v13, %v949_v13 }
 0x293   : > { %v2715_v17 = vpack.c.bf16 %v951_v14, %v949_v13 }
 0x295   : > { %960 = vrot.lane.b32.xlu0 %v2715_v17, %s2902_s23 }
 0x299   : > { %1216 = vrot.lane.b32.xlu0 %v3123_v18, %s2904_s19 }
 0x29d   : > { %1449 = vrot.lane.b32.xlu0 %v3123_v18, %s2905_s22 }
 0x307   : > { %v961_v6 = vpop.permute.xlu0 %960 }
 0x308   : > { %v962_v43 = vrot.slane %v961_v6, 4 }
 0x30a   : > { %v964_v9 = vsel %vm963_vm15, %v962_v43, %v961_v6  ;;  %971 = vst.msk [vmem:[#allocation2 + $0x8] sm:$0x3] %vm523_vm6, %v962_v43  ;;  %vm1241_vm6 = vcmask 1031168  }
 0x30b   : > { %970 = vst.msk [vmem:[#allocation2] sm:$0x33] %vm969_vm13, %v964_v9  ;;  %v1217_v12 = vpop.permute.xlu0 %1216  ;;  %vm1394_vm13 = vcmask 908288  }
 0x30c   : > { %v1218_v20 = vrot.slane %v1217_v12, 4 }
 0x30e   : > { %v1220_v21 = vsel %vm1219_vm14, %v1218_v20, %v1217_v12 }
 0x30f   : > { %v1450_v42 = vpop.permute.xlu0 %1449 }
 0x310   : > { %v1451_v46 = vrot.slane %v1450_v42, 4 }
 0x311   : > { %v1102_v30 = vld [vmem:[#allocation2 + $0x8] sm:$0xf] }
 0x312   : > { %v3133_v22 = vld [vmem:[#allocation2] sm:$0xff]  ;;  %v1224_v33 = vmul.bf16 %v1218_v20, %v1102_v30  ;;  %v2639_v35 = vcombine.low %v1102_v30, %v1102_v30  ;;  %v3160_v41 = vld [vmem:[#allocation2 + $0x8] sm:$0xf]  ;;  %v1453_v49 = vsel %vm1452_vm2, %v1451_v46, %v1450_v42 }
 0x313   : > { %v1223_v24 = vmul.bf16 %v3133_v22, %v1220_v21  ;;  %v3138_v25 = vcombine.high %v3133_v22, %v3133_v22  ;;  %v3142_v26 = vcombine.low %v3133_v22, %v3133_v22  ;;  %v1037_v28 = vmul.bf16 %v3110_v27, %v3133_v22  ;;  %v2644_v30 = vld [vmem:[%s3443_s11 + $0x4] sm:$0x3] }
 0x314   : > { %v1305_v39 = vmul.bf16 %v1302_v37, %v3133_v22  ;;  %v2647_v40 = vcombine.low %v1224_v33, %v1224_v33  ;;  %v1306_v44 = vmul.bf16 %v1300_v29, %v3160_v41  ;;  %v1456_v51 = vmul.bf16 %v1453_v49, %v3133_v22 }
 0x315   : > { %1115 = vrot.lane.b32.xlu1 %v3138_v25, %s2906_s10  ;;  %1113 = vrot.lane.b32.xlu0 %v3142_v26, %s2906_s10  ;;  %v2633_v31 = vcombine.high %v1037_v28, %v1037_v28  ;;  %v2632_v32 = vcombine.low %v1037_v28, %v1037_v28  ;;  %v2645_v36 = vcombine.low %v1223_v24, %v1223_v24 }
 0x316   : > { %v2646_v7 = vcombine.high %v1223_v24, %v1223_v24  ;;  %v2651_v45 = vcombine.low %v1305_v39, %v1305_v39  ;;  %v2652_v47 = vcombine.high %v1305_v39, %v1305_v39  ;;  %v2653_v48 = vcombine.low %v1306_v44, %v1306_v44  ;;  %v2650_v39 = vld [vmem:[%s3443_s11 + $0x6] sm:$0x3] }
 0x317   : > { %2634 = vmatprep.subr.msk.bf16.mxu0 %vm549_vm0, %v2633_v31  ;;  %v1048_v34 = vsel %vm549_vm0, %v2632_v32, 0  ;;  %v1457_v53 = vmul.bf16 %v1451_v46, %v3160_v41  ;;  %v2659_v54 = vcombine.low %v3160_v41, %v3160_v41  ;;  %v2663_v55 = vcombine.low %v1456_v51, %v1456_v51  ;;  %v992_v32 = vld [vmem:[%s3444_s12] sm:$0xf]  ;;  %v2656_v46 = vld [vmem:[%s3443_s11 + $0x8] sm:$0x3] }
 0x318   : > { %1054 = vmatpush1.bf16.msra.mxu0 %v1048_v34  ;;  %v1536_v57 = vmul.bf16 %v1533_v56, %v3133_v22  ;;  %v2664_v58 = vcombine.high %v1456_v51, %v1456_v51  ;;  %v1537_v60 = vmul.bf16 %v1531_v52, %v3160_v41 }
 0x319   : > { %1117 = vrot.lane.b32.xlu0 %v2639_v35, %s2906_s10  ;;  %1235 = vrot.lane.b32.xlu1 %v2645_v36, %s2907_s29  ;;  %v2665_v59 = vcombine.low %v1457_v53, %v1457_v53  ;;  %v2662_v53 = vld [vmem:[%s3443_s11 + $0xa] sm:$0x3] }
 0x31a   : > { %v2669_v61 = vcombine.low %v1536_v57, %v1536_v57  ;;  %v2670_v62 = vcombine.high %v1536_v57, %v1536_v57  ;;  %v2671_v63 = vcombine.low %v1537_v60, %v1537_v60 }
 0x31b   : > { %2635 = vmatmul.mubr.msk.bf16.vlgmr.msra.gmra.mrb[4].mxu0 %vm542_vm1, %v1038_v38 }
 0x31c   : > { %1163 = vmatprep.mubr.bf16.mxu0 %v2894_v5 }
 0x31d   : > { %1237 = vrot.lane.b32.xlu0 %v2646_v7, %s2907_s29  ;;  %1239 = vrot.lane.b32.xlu1 %v2647_v40, %s2907_s29 }
 0x321   : > { %1672 = vrot.lane.b32.xlu0 %v3123_v18, %s2908_s30  ;;  %1317 = vrot.lane.b32.xlu1 %v2651_v45, %s2900_s17 }
 0x325   : > { %1319 = vrot.lane.b32.xlu0 %v2652_v47, %s2900_s17  ;;  %1321 = vrot.lane.b32.xlu1 %v2653_v48, %s2900_s17 }
 0x329   : > { %1388 = vrot.lane.b32.xlu0 %v3142_v26, %s3455_s16  ;;  %1390 = vrot.lane.b32.xlu1 %v3138_v25, %s3455_s16 }
 0x32d   : > { %1392 = vrot.lane.b32.xlu0 %v2659_v54, %s3455_s16  ;;  %1468 = vrot.lane.b32.xlu1 %v2663_v55, %s3453_s24 }
 0x331   : > { %1470 = vrot.lane.b32.xlu0 %v2664_v58, %s3453_s24  ;;  %1472 = vrot.lane.b32.xlu1 %v2665_v59, %s3453_s24  ;;  %v2668_v59 = vld [vmem:[%s3443_s11 + $0xc] sm:$0x3]  ;;  %s3476_s24 = sshll.u32 %s3478_s21, 3 }
 0x335   : > { %1548 = vrot.lane.b32.xlu0 %v2669_v61, %s3449_s18  ;;  %1550 = vrot.lane.b32.xlu1 %v2670_v62, %s3449_s18  ;;  %v2674_v61 = vld [vmem:[%s3443_s11 + $0xe] sm:$0x3] }
 0x339   : > { %1552 = vrot.lane.b32.xlu0 %v2671_v63, %s3449_s18  ;;  %1611 = vrot.lane.b32.xlu1 %v3142_v26, %s3451_s25 }
 0x33d   : > { %1613 = vrot.lane.b32.xlu0 %v3138_v25, %s3451_s25  ;;  %1615 = vrot.lane.b32.xlu1 %v2659_v54, %s3451_s25  ;;  %s2912_s25 = smov 94  }
 0x387   : > { %v1116_v0 = vpop.permute.xlu1 %1115  ;;  %v1114_v1 = vpop.permute.xlu0 %1113 }
 0x388   : > { %v1120_v2 = vsel %vm1119_vm3, %v1114_v1, %v1116_v0 }
 0x389   : > { %v1126_v10 = vsel %vm549_vm0, %v1120_v2, 0 }
 0x38b   : > { %v1236_v3 = vpop.permute.xlu1 %1235  ;;  %v1118_v4 = vpop.permute.xlu0 %1117 }
 0x38c   : > { %v1121_v8 = vsel %vm1119_vm3, %v1116_v0, %v1118_v4  ;;  %v2677_v4 = vld [vmem:[%s3443_s11 + $0x10] sm:$0x3] }
 0x38d   : > { %2640 = vmatprep.subr.msk.bf16.mxu0 %vm549_vm0, %v1121_v8  ;;  %v2913_v8 = vmov 1983009808  }
 0x38e   : > { %1132 = vmatpush1.bf16.msra.mxu0 %v1126_v10  ;;  %v1760_v10 = vunpack.c.l.s4 %v2913_v8 }
 0x38f   : > { %v1240_v13 = vpop.permute.xlu1 %1239  ;;  %v1238_v14 = vpop.permute.xlu0 %1237 }
 0x390   : > { %v1242_v15 = vsel %vm1241_vm6, %v1236_v3, %v1238_v14  ;;  %v1243_v16 = vsel %vm1241_vm6, %v1238_v14, %v1240_v13 }
 0x391   : > { %v1248_v17 = vsel %vm549_vm0, %v1242_v15, 0  ;;  %2641 = vmatmul.mubr.msk.bf16.vlgmr.msra.gmra.mrb[4].mxu0 %vm542_vm1, %v2636_v11  ;;  %2648 = vmatprep.subr.msk.bf16.mxu0 %vm549_vm0, %v1243_v16  ;;  %v1761_v11 = vunpack.c.0.s8 %v1760_v10 }
 0x392   : > { %1254 = vmatpush1.bf16.msra.mxu0 %v1248_v17  ;;  %1285 = vmatprep.mubr.bf16.mxu0 %v2894_v5 }
 0x393   : > { %v1318_v6 = vpop.permute.xlu1 %1317  ;;  %v1673_v43 = vpop.permute.xlu0 %1672  ;;  %v3276_v13 = vsub.s32 %v1761_v11, %v3104_v19 }
 0x394   : > { %v1674_v9 = vrot.slane %v1673_v43, 4 }
 0x395   : > { %v3280_v14 = vrot.slane %v3123_v18, %v3276_v13 }
 0x396   : > { %v1676_v12 = vsel %vm1675_vm8, %v1674_v9, %v1673_v43  ;;  %v1680_v25 = vmul.bf16 %v1674_v9, %v3160_v41 }
 0x397   : > { %v1679_v20 = vmul.bf16 %v1676_v12, %v3133_v22  ;;  %v1322_v21 = vpop.permute.xlu1 %1321  ;;  %v1320_v23 = vpop.permute.xlu0 %1319 }
 0x398   : > { %v1325_v24 = vsel %vm3457_vm10, %v1320_v23, %v1322_v21  ;;  %v1324_v29 = vsel %vm3457_vm10, %v1318_v6, %v1320_v23  ;;  %v2680_v34 = vcombine.low %v1680_v25, %v1680_v25  ;;  %vm3458_vm10 = vcmask 900096  }
 0x399   : > { %2654 = vmatprep.subr.msk.bf16.mxu0 %vm549_vm0, %v1325_v24  ;;  %v2679_v26 = vcombine.high %v1679_v20, %v1679_v20  ;;  %v2678_v28 = vcombine.low %v1679_v20, %v1679_v20  ;;  %v1330_v33 = vsel %vm549_vm0, %v1324_v29, 0  ;;  %v1785_v23 = vrot.slane %v3110_v27, %v3276_v13 }
 0x39b   : > { %v1391_v31 = vpop.permute.xlu1 %1390  ;;  %1693 = vrot.lane.b32.xlu1 %v2679_v26, %s2912_s25  ;;  %1691 = vrot.lane.b32.xlu0 %v2678_v28, %s2912_s25  ;;  %v1389_v22 = vpop.permute.xlu0 %1388 }
 0x39c   : > { %v1395_v38 = vsel %vm1394_vm13, %v1389_v22, %v1391_v31 }
 0x39d   : > { %2649 = vmatmul.mubr.msk.bf16.vlgmr.msra.gmra.mrb[4].mxu0 %vm542_vm1, %v2644_v30  ;;  %v1401_v41 = vsel %vm549_vm0, %v1395_v38, 0 }
 0x39e   : > { %1336 = vmatpush1.bf16.msra.mxu0 %v1330_v33  ;;  %1367 = vmatprep.mubr.bf16.mxu0 %v2894_v5 }
 0x39f   : > { %1096 = vperm.xlu1 %2866, %v992_v32   ;;  %1695 = vrot.lane.b32.xlu0 %v2680_v34, %s2912_s25  ;;  %v1393_v35 = vpop.permute.xlu0 %1392  ;;  %v1469_v37 = vpop.permute.xlu1 %1468 }
 0x3a0   : > { %v1396_v36 = vsel %vm1394_vm13, %v1391_v31, %v1393_v35 }
 0x3a1   : > { %2660 = vmatprep.subr.msk.bf16.mxu0 %vm549_vm0, %v1396_v36 }
 0x3a3   : > { %v1473_v7 = vpop.permute.xlu1 %1472  ;;  %v1471_v40 = vpop.permute.xlu0 %1470  ;;  %1944 = vrot.lane.b32.xlu1 %v3280_v14, %s2904_s19  ;;  %s3463_s19 = smov 110  }
 0x3a4   : > { %v1476_v42 = vsel %vm3458_vm10, %v1471_v40, %v1473_v7  ;;  %v1475_v45 = vsel %vm3458_vm10, %v1469_v37, %v1471_v40  ;;  %vm3459_vm10 = vcmask 777216  }
 0x3a5   : > { %v1481_v49 = vsel %vm549_vm0, %v1475_v45, 0 }
 0x3a7   : > { %v1549_v44 = vpop.permute.xlu0 %1548  ;;  %v1551_v47 = vpop.permute.xlu1 %1550  ;;  %2196 = vrot.lane.b32.xlu1 %v3280_v14, %s2905_s22  ;;  %s3465_s22 = smov 95  }
 0x3a8   : > { %v1555_v52 = vsel %vm3461_vm9, %v1549_v44, %v1551_v47 }
 0x3a9   : > { %2655 = vmatmul.mubr.msk.bf16.vlgmr.msra.gmra.mrb[4].mxu0 %vm542_vm1, %v2650_v39  ;;  %v1561_v56 = vsel %vm549_vm0, %v1555_v52, 0 }
 0x3aa   : > { %1407 = vmatpush1.bf16.msra.mxu0 %v1401_v41  ;;  %1438 = vmatprep.mubr.bf16.mxu0 %v2894_v5 }
 0x3ab   : > { %2666 = vmatprep.subr.msk.bf16.mxu0 %vm549_vm0, %v1476_v42  ;;  %v1553_v48 = vpop.permute.xlu0 %1552  ;;  %v1612_v51 = vpop.permute.xlu1 %1611 }
 0x3ac   : > { %v1556_v50 = vsel %vm3461_vm9, %v1551_v47, %v1553_v48  ;;  %v1788_v47 = vld [vmem:[%s3445_s13] sm:$0x3] }
 0x3af   : > { %v1616_v54 = vpop.permute.xlu1 %1615  ;;  %v1614_v55 = vpop.permute.xlu0 %1613 }
 0x3b0   : > { %v1619_v57 = vsel %vm3459_vm10, %v1614_v55, %v1616_v54  ;;  %v1618_v58 = vsel %vm3459_vm10, %v1612_v51, %v1614_v55  ;;  %vm3460_vm10 = vcmask 769024  }
 0x3b1   : > { %v1624_v60 = vsel %vm549_vm0, %v1618_v58, 0 }
 0x3b5   : > { %2661 = vmatmul.mubr.msk.bf16.vlgmr.msra.gmra.mrb[4].mxu0 %vm542_vm1, %v2656_v46 }
 0x3b6   : > { %1487 = vmatpush1.bf16.msra.mxu0 %v1481_v49  ;;  %1518 = vmatprep.mubr.bf16.mxu0 %v2894_v5 }
 0x3b7   : > { %2672 = vmatprep.subr.msk.bf16.mxu0 %vm549_vm0, %v1556_v50 }
 0x3c1   : > { %2667 = vmatmul.mubr.msk.bf16.vlgmr.msra.gmra.mrb[4].mxu0 %vm542_vm1, %v2662_v53 }
 0x3c2   : > { %1567 = vmatpush1.bf16.msra.mxu0 %v1561_v56  ;;  %1598 = vmatprep.mubr.bf16.mxu0 %v2894_v5 }
 0x3c3   : > { %2675 = vmatprep.subr.msk.bf16.mxu0 %vm549_vm0, %v1619_v57 }
 0x3cd   : > { %2673 = vmatmul.mubr.msk.bf16.vlgmr.msra.gmra.mrb[4].mxu0 %vm542_vm1, %v2668_v59 }
 0x3ce   : > { %1630 = vmatpush1.bf16.msra.mxu0 %v1624_v60  ;;  %1661 = vmatprep.mubr.bf16.mxu0 %v2894_v5 }
 0x3d9   : > { %2676 = vmatmul.mubr.msk.bf16.vlgmr.msra.gmra.mrb[4].mxu0 %vm542_vm1, %v2674_v61 }
 0x3da   : > { %1741 = vmatprep.mubr.bf16.mxu0 %v2894_v5 }
 0x40d   : > { %v1694_v62 = vpop.permute.xlu1 %1693  ;;  %v1692_v63 = vpop.permute.xlu0 %1691 }
 0x40e   : > { %v1698_v0 = vsel %vm3460_vm10, %v1692_v63, %v1694_v62 }
 0x40f   : > { %v1704_v3 = vsel %vm549_vm0, %v1698_v0, 0 }
 0x411   : > { %v1696_v1 = vpop.permute.xlu0 %1695 }
 0x412   : > { %v1699_v2 = vsel %vm3460_vm10, %v1694_v62, %v1696_v1  ;;  %vm1773_vm10 = vcmask 136196  }
 0x413   : > { %2681 = vmatprep.subr.msk.bf16.mxu0 %vm549_vm0, %v1699_v2  ;;  %vm525_vm0 = vcmask 271496  }
 0x414   : > { %1710 = vmatpush1.bf16.msra.mxu0 %v1704_v3  ;;  %526 = vst.msk [vmem:[#allocation3 + $0x4] sm:$0x3] %vm525_vm0, %v2894_v5 }
 0x417   : > { %2682 = vmatmul.mubr.msk.bf16.vlgmr.msra.gmra.mrb[4].mxu0 %vm542_vm1, %v2677_v4  ;;  %vm1771_vm1 = vcmask 1043458  }
 0x418   : > { %vm1772_vm0 = vmor %vm1771_vm1, %vm967_vm7 }
 0x419   : > { %vm1774_vm9 = vmor %vm1773_vm10, %vm1772_vm0 }
 0x41e   : > { %v1097_v15 = vpop.permute.xlu1 %1096 }
 0x422   : > { %v1945_v28 = vpop.permute.xlu1 %1944 }
 0x423   : > { %v1946_v29 = vrot.slane %v1945_v28, 6 }
 0x425   : > { %v1947_v30 = vsel %vm1219_vm14, %v1946_v29, %v1945_v28  ;;  %vm3472_vm14 = vcmask 777216  }
 0x426   : > { %v2197_v50 = vpop.permute.xlu1 %2196 }
 0x427   : > { %v2198_v53 = vrot.slane %v2197_v50, 6 }
 0x429   : > { %v2199_v59 = vsel %vm1452_vm2, %v2198_v53, %v2197_v50  ;;  %vm3473_vm2 = vmmov %vm3472_vm14 }
 0x4ea   : > { %v1743_v16 = vpop.f32.mrb[4].mxu0 }
 0x4eb   : > { %v2730_v17 = vadd.f32 %v1743_v16, %v1097_v15  ;;  %v1745_v6 = vpop.f32.mrb[5].mxu0 }
 0x4ec   : > { %v2731_v43 = vadd.f32 %v1745_v6, %v1097_v15  ;;  %v1747_v19 = vpop.f32.mrb[6].mxu0 }
 0x4ed   : > { %v1752_v9 = vmax.f32 %v2730_v17, 0.0  ;;  %v1748_v12 = vpop.f32.mrb[7].mxu0 }
 0x4ee   : > { %v1753_v20 = vmax.f32 %v2731_v43, 0.0 }
 0x4f0   : > { %v2683_v18 = vpack.c.bf16 %v1753_v20, %v1752_v9 }
 0x4f2   : > { %v1765_v21 = vrot.slane %v2683_v18, %v3276_v13 }
 0x4f4   : > { %1766 = vrot.lane.b32.xlu0 %v1765_v21, %s2902_s23  ;;  %s3462_s23 = smov 111  }
 0x4f8   : > { %2030 = vrot.lane.b32.xlu0 %v1785_v23, %s2895_s27  ;;  %s516_s27 = scalar_lea.vmem %s3447_s15, %s3476_s24 }
 0x4fc   : > { %2282 = vrot.lane.b32.xlu0 %v1785_v23, %s2896_s28 }
 0x566   : > { %v1767_v24 = vpop.permute.xlu0 %1766 }
 0x567   : > { %v1768_v25 = vrot.slane %v1767_v24, 6 }
 0x569   : > { %v1769_v26 = vsel %vm963_vm15, %v1768_v25, %v1767_v24  ;;  %vm3470_vm15 = vcmask 785408  }
 0x56a   : > { %1775 = vst.msk [vmem:[#allocation3] sm:$0x3f] %vm1774_vm9, %v1769_v26  ;;  %v2031_v33 = vpop.permute.xlu0 %2030  ;;  %vm3468_vm9 = vcmask 900096   ;;  %vm3471_vm7 = vmmov %vm3470_vm15 }
 0x56b   : > { %v2032_v37 = vrot.slane %v2031_v33, 6  ;;  %vm3469_vm10 = vmmov %vm3468_vm9 }
 0x56d   : > { %v2033_v44 = vsel %vm751_vm4, %v2032_v37, %v2031_v33  ;;  %vm3466_vm4 = vcmask 916480  }
 0x56e   : > { %v2283_v56 = vpop.permute.xlu0 %2282 }
 0x56f   : > { %v2284_v62 = vrot.slane %v2283_v56, 6 }
 0x571   : > { %v1935_v31 = vld [vmem:[#allocation3] sm:$0x3f]  ;;  %v2285_v3 = vsel %vm753_vm5, %v2284_v62, %v2283_v56  ;;  %vm3467_vm5 = vmmov %vm3466_vm4 }
 0x572   : > { %v1855_v27 = vld [vmem:[#allocation3] sm:$0x3f]  ;;  %v1949_v32 = vmul.bf16 %v1947_v30, %v1935_v31  ;;  %v2686_v30 = vld [vmem:[%s3445_s13 + $0x2] sm:$0x3] }
 0x573   : > { %v1777_v22 = vld [vmem:[#allocation3] sm:$0xf]  ;;  %v1866_v34 = vrot.slane %v1855_v27, %v3276_v13  ;;  %v1859_v35 = vcombine.high %v1855_v27, %v1855_v27 }
 0x574   : > { %v1787_v36 = vmul.bf16 %v1785_v23, %v1777_v22  ;;  %v1960_v41 = vrot.slane %v1949_v32, %v3276_v13  ;;  %v2029_v42 = vld [vmem:[#allocation3] sm:$0x3f]  ;;  %v1953_v45 = vcombine.high %v1949_v32, %v1949_v32 }
 0x575   : > { %1875 = vrot.lane.b32.xlu1 %v1866_v34, %s2906_s10  ;;  %v1874_v38 = vcombine.high %v1866_v34, %v1866_v34  ;;  %v1873_v7 = vrot.slane %v1859_v35, %v3276_v13  ;;  %v2035_v48 = vmul.bf16 %v2033_v44, %v2029_v42  ;;  %v2115_v55 = vld [vmem:[#allocation3] sm:$0x3f] }
 0x576   : > { %v1796_v39 = vrot.slane %v1787_v36, %v3276_v13  ;;  %v1968_v49 = vcombine.high %v1960_v41, %v1960_v41  ;;  %v1967_v51 = vrot.slane %v1953_v45, %v3276_v13  ;;  %v2195_v58 = vld [vmem:[#allocation3] sm:$0x3f]  ;;  %v2126_v61 = vrot.slane %v2115_v55, %v3276_v13 }
 0x577   : > { %1877 = vrot.lane.b32.xlu0 %v1874_v38, %s2906_s10  ;;  %v2046_v52 = vrot.slane %v2035_v48, %v3276_v13  ;;  %v2039_v54 = vcombine.high %v2035_v48, %v2035_v48  ;;  %v2201_v63 = vmul.bf16 %v2199_v59, %v2195_v58  ;;  %v2119_v0 = vcombine.high %v2115_v55, %v2115_v55  ;;  %v2281_v2 = vld [vmem:[#allocation3] sm:$0x3f] }
 0x578   : > { %v1797_v40 = vcombine.high %v1796_v39, %v1796_v39  ;;  %v1802_v46 = vsel %vm785_vm11, %v1796_v39, 0  ;;  %v2134_v1 = vcombine.high %v2126_v61, %v2126_v61  ;;  %v2287_v11 = vmul.bf16 %v2285_v3, %v2281_v2  ;;  %v2367_v6 = vld [vmem:[#allocation3] sm:$0x3f] }
 0x579   : > { %1879 = vrot.lane.b32.xlu1 %v1873_v7, %s2906_s10  ;;  %v2054_v57 = vcombine.high %v2046_v52, %v2046_v52  ;;  %v2053_v60 = vrot.slane %v2039_v54, %v3276_v13  ;;  %v2133_v4 = vrot.slane %v2119_v0, %v3276_v13  ;;  %v2212_v8 = vrot.slane %v2201_v63, %v3276_v13  ;;  %v2447_v37 = vld [vmem:[#allocation3] sm:$0x3f] }
 0x57a   : > { %2684 = vmatprep.subr.msk.bf16.mxu1 %vm785_vm11, %v1797_v40  ;;  %v2205_v10 = vcombine.high %v2201_v63, %v2201_v63  ;;  %v2298_v16 = vrot.slane %v2287_v11, %v3276_v13  ;;  %v2291_v17 = vcombine.high %v2287_v11, %v2287_v11  ;;  %v2378_v9 = vrot.slane %v2367_v6, %v3276_v13  ;;  %v2695_v63 = vld [vmem:[%s3445_s13 + $0x8] sm:$0x3] }
 0x57b   : > { %1808 = vmatpush1.bf16.msra.mxu1 %v1802_v46  ;;  %1969 = vrot.lane.b32.xlu0 %v1960_v41, %s2907_s29  ;;  %v2371_v12 = vcombine.high %v2367_v6, %v2367_v6  ;;  %v2689_v46 = vld [vmem:[%s3445_s13 + $0x4] sm:$0x3]  ;;  %v2701_v6 = vld [vmem:[%s3445_s13 + $0xc] sm:$0x3] }
 0x57c   : > { %v2219_v15 = vrot.slane %v2205_v10, %v3276_v13  ;;  %v2306_v43 = vcombine.high %v2298_v16, %v2298_v16  ;;  %v2305_v19 = vrot.slane %v2291_v17, %v3276_v13  ;;  %v2386_v20 = vcombine.high %v2378_v9, %v2378_v9  ;;  %v2698_v10 = vld [vmem:[%s3445_s13 + $0xa] sm:$0x3] }
 0x57d   : > { %1971 = vrot.lane.b32.xlu1 %v1968_v49, %s2907_s29  ;;  %v2385_v18 = vrot.slane %v2371_v12, %v3276_v13 }
 0x57e   : > { %2685 = vmatmul.mubr.msk.bf16.vlgmr.msra.gmra.mrb[4].mxu1 %vm781_vm12, %v1788_v47 }
 0x57f   : > { %1924 = vmatprep.mubr.bf16.mxu1 %v2894_v5  ;;  %1973 = vrot.lane.b32.xlu0 %v1967_v51, %s2907_s29 }
 0x581   : > { %2448 = vrot.lane.b32.xlu1 %v3280_v14, %s2908_s30  ;;  %v2220_v14 = vcombine.high %v2212_v8, %v2212_v8 }
 0x583   : > { %2055 = vrot.lane.b32.xlu0 %v2046_v52, %s2900_s17  ;;  %v1776_v52 = vld [vmem:[%s3446_s14] sm:$0xf] }
 0x585   : > { %2057 = vrot.lane.b32.xlu1 %v2054_v57, %s2900_s17 }
 0x587   : > { %2059 = vrot.lane.b32.xlu0 %v2053_v60, %s2900_s17  ;;  %s3464_s17 = smov 96  }
 0x589   : > { %2135 = vrot.lane.b32.xlu1 %v2126_v61, %s3462_s23 }
 0x58b   : > { %2137 = vrot.lane.b32.xlu0 %v2134_v1, %s3462_s23 }
 0x58d   : > { %2139 = vrot.lane.b32.xlu1 %v2133_v4, %s3462_s23 }
 0x58f   : > { %2221 = vrot.lane.b32.xlu0 %v2212_v8, %s3463_s19 }
 0x591   : > { %2223 = vrot.lane.b32.xlu1 %v2220_v14, %s3463_s19 }
 0x593   : > { %2225 = vrot.lane.b32.xlu0 %v2219_v15, %s3463_s19 }
 0x595   : > { %2307 = vrot.lane.b32.xlu1 %v2298_v16, %s3464_s17 }
 0x597   : > { %2309 = vrot.lane.b32.xlu0 %v2306_v43, %s3464_s17 }
 0x599   : > { %2311 = vrot.lane.b32.xlu1 %v2305_v19, %s3464_s17  ;;  %v2704_v19 = vld [vmem:[%s3445_s13 + $0xe] sm:$0x3] }
 0x59b   : > { %2387 = vrot.lane.b32.xlu0 %v2378_v9, %s3465_s22 }
 0x59d   : > { %2389 = vrot.lane.b32.xlu1 %v2386_v20, %s3465_s22 }
 0x59f   : > { %2391 = vrot.lane.b32.xlu0 %v2385_v18, %s3465_s22 }
 0x5e7   : > { %v1876_v21 = vpop.permute.xlu1 %1875 }
 0x5e9   : > { %v1878_v23 = vpop.permute.xlu0 %1877 }
 0x5ea   : > { %v1881_v24 = vsel %vm1119_vm3, %v1876_v21, %v1878_v23 }
 0x5eb   : > { %v1880_v25 = vpop.permute.xlu1 %1879  ;;  %v1887_v28 = vsel %vm785_vm11, %v1881_v24, 0  ;;  %v2707_v24 = vld [vmem:[%s3445_s13 + $0x10] sm:$0x3] }
 0x5ec   : > { %v1882_v26 = vsel %vm1119_vm3, %v1878_v23, %v1880_v25  ;;  %vm3474_vm3 = vcmask 769024  }
 0x5ed   : > { %2687 = vmatprep.subr.msk.bf16.mxu1 %vm785_vm11, %v1882_v26  ;;  %v1970_v29 = vpop.permute.xlu0 %1969 }
 0x5ee   : > { %1893 = vmatpush1.bf16.msra.mxu1 %v1887_v28 }
 0x5ef   : > { %v1972_v31 = vpop.permute.xlu1 %1971 }
 0x5f0   : > { %v1975_v27 = vsel %vm1241_vm6, %v1970_v29, %v1972_v31 }
 0x5f1   : > { %2688 = vmatmul.mubr.msk.bf16.vlgmr.msra.gmra.mrb[4].mxu1 %vm781_vm12, %v2686_v30  ;;  %v1974_v22 = vpop.permute.xlu0 %1973  ;;  %v1981_v33 = vsel %vm785_vm11, %v1975_v27, 0 }
 0x5f2   : > { %v1976_v32 = vsel %vm1241_vm6, %v1972_v31, %v1974_v22  ;;  %2018 = vmatprep.mubr.bf16.mxu1 %v2894_v5  ;;  %vm3475_vm6 = vmmov %vm3474_vm3 }
 0x5f3   : > { %v2449_v34 = vpop.permute.xlu1 %2448  ;;  %2690 = vmatprep.subr.msk.bf16.mxu1 %vm785_vm11, %v1976_v32 }
 0x5f4   : > { %v2450_v35 = vrot.slane %v2449_v34, 6  ;;  %1987 = vmatpush1.bf16.msra.mxu1 %v1981_v33 }
 0x5f5   : > { %v2056_v36 = vpop.permute.xlu0 %2055 }
 0x5f6   : > { %v2451_v38 = vsel %vm1675_vm8, %v2450_v35, %v2449_v34 }
 0x5f7   : > { %v2453_v39 = vmul.bf16 %v2451_v38, %v2447_v37  ;;  %v2058_v7 = vpop.permute.xlu1 %2057 }
 0x5f8   : > { %v2061_v44 = vsel %vm3466_vm4, %v2056_v36, %v2058_v7 }
 0x5f9   : > { %v2457_v40 = vcombine.high %v2453_v39, %v2453_v39  ;;  %v2060_v41 = vpop.permute.xlu0 %2059  ;;  %v2464_v42 = vrot.slane %v2453_v39, %v3276_v13  ;;  %v2067_v49 = vsel %vm785_vm11, %v2061_v44, 0 }
 0x5fa   : > { %v2062_v45 = vsel %vm3467_vm5, %v2058_v7, %v2060_v41 }
 0x5fb   : > { %v2136_v47 = vpop.permute.xlu1 %2135  ;;  %2473 = vrot.lane.b32.xlu1 %v2464_v42, %s2912_s25  ;;  %2693 = vmatprep.subr.msk.bf16.mxu1 %vm785_vm11, %v2062_v45  ;;  %v2472_v48 = vcombine.high %v2464_v42, %v2464_v42  ;;  %v2471_v51 = vrot.slane %v2457_v40, %v3276_v13  ;;  %v2692_v13 = vld [vmem:[%s3445_s13 + $0x6] sm:$0x3] }
 0x5fd   : > { %2475 = vrot.lane.b32.xlu0 %v2472_v48, %s2912_s25  ;;  %2691 = vmatmul.mubr.msk.bf16.vlgmr.msra.gmra.mrb[4].mxu1 %vm781_vm12, %v2689_v46  ;;  %v2138_v50 = vpop.permute.xlu0 %2137 }
 0x5fe   : > { %2073 = vmatpush1.bf16.msra.mxu1 %v2067_v49  ;;  %2104 = vmatprep.mubr.bf16.mxu1 %v2894_v5  ;;  %v2141_v56 = vsel %vm1394_vm13, %v2136_v47, %v2138_v50 }
 0x5ff   : > { %v2140_v53 = vpop.permute.xlu1 %2139  ;;  %2477 = vrot.lane.b32.xlu1 %v2471_v51, %s2912_s25  ;;  %v2147_v59 = vsel %vm785_vm11, %v2141_v56, 0 }
 0x600   : > { %v2142_v54 = vsel %vm1394_vm13, %v2138_v50, %v2140_v53 }
 0x601   : > { %1850 = vperm.xlu0 %2867, %v1776_v52   ;;  %2696 = vmatprep.subr.msk.bf16.mxu1 %vm785_vm11, %v2142_v54  ;;  %v2222_v55 = vpop.permute.xlu0 %2221 }
 0x603   : > { %v2224_v57 = vpop.permute.xlu1 %2223 }
 0x604   : > { %v2227_v62 = vsel %vm3469_vm10, %v2222_v55, %v2224_v57 }
 0x605   : > { %v2226_v58 = vpop.permute.xlu0 %2225  ;;  %v2233_v2 = vsel %vm785_vm11, %v2227_v62, 0 }
 0x606   : > { %v2228_v60 = vsel %vm3468_vm9, %v2224_v57, %v2226_v58 }
 0x607   : > { %v2308_v61 = vpop.permute.xlu1 %2307 }
 0x609   : > { %2694 = vmatmul.mubr.msk.bf16.vlgmr.msra.gmra.mrb[4].mxu1 %vm781_vm12, %v2692_v13  ;;  %v2310_v0 = vpop.permute.xlu0 %2309 }
 0x60a   : > { %2153 = vmatpush1.bf16.msra.mxu1 %v2147_v59  ;;  %2184 = vmatprep.mubr.bf16.mxu1 %v2894_v5  ;;  %v2313_v8 = vsel %vm3471_vm7, %v2308_v61, %v2310_v0 }
 0x60b   : > { %2699 = vmatprep.subr.msk.bf16.mxu1 %vm785_vm11, %v2228_v60  ;;  %v2312_v1 = vpop.permute.xlu1 %2311  ;;  %v2319_v14 = vsel %vm785_vm11, %v2313_v8, 0 }
 0x60c   : > { %v2314_v3 = vsel %vm3470_vm15, %v2310_v0, %v2312_v1 }
 0x60d   : > { %v2388_v4 = vpop.permute.xlu0 %2387 }
 0x60f   : > { %v2390_v15 = vpop.permute.xlu1 %2389 }
 0x610   : > { %v2393_v17 = vsel %vm3473_vm2, %v2388_v4, %v2390_v15 }
 0x611   : > { %v2392_v11 = vpop.permute.xlu0 %2391  ;;  %v2399_v43 = vsel %vm785_vm11, %v2393_v17, 0 }
 0x612   : > { %v2394_v16 = vsel %vm3472_vm14, %v2390_v15, %v2392_v11 }
 0x615   : > { %2697 = vmatmul.mubr.msk.bf16.vlgmr.msra.gmra.mrb[4].mxu1 %vm781_vm12, %v2695_v63 }
 0x616   : > { %2239 = vmatpush1.bf16.msra.mxu1 %v2233_v2  ;;  %2270 = vmatprep.mubr.bf16.mxu1 %v2894_v5 }
 0x617   : > { %2702 = vmatprep.subr.msk.bf16.mxu1 %vm785_vm11, %v2314_v3 }
 0x621   : > { %2700 = vmatmul.mubr.msk.bf16.vlgmr.msra.gmra.mrb[4].mxu1 %vm781_vm12, %v2698_v10 }
 0x622   : > { %2325 = vmatpush1.bf16.msra.mxu1 %v2319_v14  ;;  %2356 = vmatprep.mubr.bf16.mxu1 %v2894_v5 }
 0x623   : > { %2705 = vmatprep.subr.msk.bf16.mxu1 %vm785_vm11, %v2394_v16 }
 0x62d   : > { %2703 = vmatmul.mubr.msk.bf16.vlgmr.msra.gmra.mrb[4].mxu1 %vm781_vm12, %v2701_v6 }
 0x62e   : > { %2405 = vmatpush1.bf16.msra.mxu1 %v2399_v43  ;;  %2436 = vmatprep.mubr.bf16.mxu1 %v2894_v5 }
 0x639   : > { %2706 = vmatmul.mubr.msk.bf16.vlgmr.msra.gmra.mrb[4].mxu1 %vm781_vm12, %v2704_v19 }
 0x63a   : > { %2522 = vmatprep.mubr.bf16.mxu1 %v2894_v5 }
 0x66d   : > { %v2474_v9 = vpop.permute.xlu1 %2473 }
 0x66f   : > { %v2476_v12 = vpop.permute.xlu0 %2475 }
 0x670   : > { %v2479_v20 = vsel %vm3474_vm3, %v2474_v9, %v2476_v12 }
 0x671   : > { %v2478_v18 = vpop.permute.xlu1 %2477  ;;  %v2485_v23 = vsel %vm785_vm11, %v2479_v20, 0 }
 0x672   : > { %v2480_v21 = vsel %vm3475_vm6, %v2476_v12, %v2478_v18 }
 0x673   : > { %2708 = vmatprep.subr.msk.bf16.mxu1 %vm785_vm11, %v2480_v21 }
 0x674   : > { %2491 = vmatpush1.bf16.msra.mxu1 %v2485_v23 }
 0x677   : > { %2709 = vmatmul.mubr.msk.bf16.vlgmr.msra.gmra.mrb[4].mxu1 %vm781_vm12, %v2707_v24 }
 0x680   : > { %v1851_v5 = vpop.permute.xlu0 %1850 }
 0x74a   : > { %v2524_v25 = vpop.f32.mrb[4].mxu1 }
 0x74b   : > { %v2732_v26 = vadd.f32 %v2524_v25, %v1851_v5  ;;  %v2526_v28 = vpop.f32.mrb[5].mxu1 }
 0x74c   : > { %v2733_v29 = vadd.f32 %v2526_v28, %v1851_v5  ;;  %v2528_v30 = vpop.f32.mrb[6].mxu1 }
 0x74d   : > { %v2533_v31 = vmax.f32 %v2732_v26, 0.0  ;;  %v2529_v27 = vpop.f32.mrb[7].mxu1 }
 0x74e   : > { %v2534_v22 = vmax.f32 %v2733_v29, 0.0 }
 0x750   : > { %v2537_v32 = vcombine.low %v2533_v31, %v2534_v22 }
 0x752   : > { %2539 = vst [vmem:[%s516_s27] sm:$0xff] %v2537_v32 }
 0x753 PF: > { %s27_s20 = sadd.s32 1, %s2892_s20  }
 0x754   : > { %p24_p4 = scmp.ge.s32.totalorder %s27_s20, 4  }
 0x756   :  { %26 = sbr.rel (!%p24_p4) target bundleno = 3 (0x3), region = 129 }

</bundles_post_ra>
